<compile_context>
chip_gen: v6e
topology: v6e:2x2x1
jax: 0.10.0
libtpu: 0.0.40
codegen_flags: <defaults>
</compile_context>

<pallas_src>
import math
from functools import partial

import jax
import jax.numpy as jnp
from jax.experimental import pallas as pl
from jax.experimental.pallas import tpu as pltpu


# ----------------------------------------------------------------------------
# Fused kernel: embedding + all decoder blocks + output projection
# ----------------------------------------------------------------------------
def decoder_kernel(
    x_ref, we_ref, be_ref, pe_ref,
    wq_ref, bq_ref, wk_ref, bk_ref, wv_ref, bv_ref, wo_ref, bo_ref,
    g1_ref, bt1_ref, w1_ref, b1_ref, w2_ref, b2_ref, g2_ref, bt2_ref,
    woutT_ref, bout_ref,
    o_ref, *, n_head, num_layers, eps=1e-5,
):
    S, D = pe_ref.shape
    Din = we_ref.shape[0]
    Dout = bout_ref.shape[1]
    H = n_head
    dh = D // H
    scale = 1.0 / math.sqrt(dh)

    # ---- sequence embedding: value linear + positional encoding -------------
    x = x_ref[0].astype(jnp.float32)                       # (S, Din)
    if Din == 1:
        # (S,1)*(1,D) broadcast multiply on the VPU (avoid a K=1 MXU matmul)
        h = x * we_ref[...] + (be_ref[...] + pe_ref[...])
    else:
        h = (jnp.dot(x, we_ref[...], preferred_element_type=jnp.float32)
             + be_ref[...] + pe_ref[...])

    # ---- causal additive bias built in-register (no HBM mask input) ---------
    row = jax.lax.broadcasted_iota(jnp.int32, (S, S), 0)
    col = jax.lax.broadcasted_iota(jnp.int32, (S, S), 1)
    attn_bias = jnp.where(col > row, -1e9, 0.0)            # (S, S) f32

    def layer_norm(z, g, b):
        mu = jnp.mean(z, axis=-1, keepdims=True)
        var = jnp.mean((z - mu) ** 2, axis=-1, keepdims=True)
        return (z - mu) * jax.lax.rsqrt(var + eps) * g + b

    # contract last dim of lhs with dim 1 of rhs, batch over the head dim
    hbat = (((2,), (1,)), ((0,), (0,)))

    for l in range(num_layers):                             # static (small L)
        wq, bq = wq_ref[l], bq_ref[l]                       # (H,D,dh), (H,1,dh)
        wk, bk = wk_ref[l], bk_ref[l]
        wv, bv = wv_ref[l], bv_ref[l]
        wo, bo = wo_ref[l], bo_ref[l]                       # (H,dh,D), (1,D)

        # ---- masked multi-head self-attention (head-batched, no slicing) ----
        hb = jnp.broadcast_to(h, (H, S, D))
        q = jax.lax.dot_general(hb, wq, hbat, preferred_element_type=jnp.float32) + bq
        k = jax.lax.dot_general(hb, wk, hbat, preferred_element_type=jnp.float32) + bk
        v = jax.lax.dot_general(hb, wv, hbat, preferred_element_type=jnp.float32) + bv

        s = jax.lax.dot_general(q, k, (((2,), (2,)), ((0,), (0,))),
                                preferred_element_type=jnp.float32) * scale
        s = s + attn_bias                                   # (H,S,S)
        m = jnp.max(s, axis=-1, keepdims=True)
        p = jnp.exp(s - m)
        p = p * pl.reciprocal(jnp.sum(p, axis=-1, keepdims=True), approx=True)

        ctx = jax.lax.dot_general(p, v, hbat, preferred_element_type=jnp.float32)   # (H,S,dh)
        attn = jax.lax.dot_general(ctx, wo, hbat, preferred_element_type=jnp.float32)  # (H,S,D)
        attn = jnp.sum(attn, axis=0) + bo                   # merge heads: (S,D)

        # ---- add & layer-norm 1 ---------------------------------------------
        h = layer_norm(h + attn, g1_ref[l], bt1_ref[l])

        # ---- position-wise FFN (ReLU) -----------------------------------------
        f = jnp.dot(h, w1_ref[l], preferred_element_type=jnp.float32) + b1_ref[l]
        f = jnp.maximum(f, 0.0)
        f = jnp.dot(f, w2_ref[l], preferred_element_type=jnp.float32) + b2_ref[l]

        # ---- add & layer-norm 2 ---------------------------------------------
        h = layer_norm(h + f, g2_ref[l], bt2_ref[l])

    # ---- output linear: d_model -> input_dim --------------------------------
    if Dout == 1:
        # multiply + row-sum on the VPU (avoid an N=1 MXU matvec)
        out = jnp.sum(h * woutT_ref[...], axis=-1, keepdims=True) + bout_ref[...]
    else:
        out = jax.lax.dot_general(h, woutT_ref[...], (((1,), (1,)), ((), ())),
                                  preferred_element_type=jnp.float32) + bout_ref[...]
    o_ref[0] = out


# ----------------------------------------------------------------------------
# Wrapper: weight re-layout (plain JAX, outside kernel) + single pallas_call
# ----------------------------------------------------------------------------
def decoder_forward(x, params, n_head):
    # x: (B, S)  ->  unsqueeze(-1)  ->  (B, S, input_dim=1)
    x = x[..., None].astype(jnp.float32)
    B, S, Din = x.shape
    D = params["we"].shape[1]
    L = len(params["layers"])
    H = n_head
    dh = D // H
    Dout = params["wout"].shape[1]

    pe = sinusoidal_pe(S, D)

    # Stack per-layer weights along a leading layer axis and pre-split the
    # attention projections per head (done once in plain JAX so the kernel
    # never needs a relayout / transpose / concatenate).
    def stack(name):
        return jnp.stack([p[name] for p in params["layers"]], axis=0)

    WQ = stack("wq").reshape(L, D, H, dh).transpose(0, 2, 1, 3)   # (L,H,D,dh)
    WK = stack("wk").reshape(L, D, H, dh).transpose(0, 2, 1, 3)
    WV = stack("wv").reshape(L, D, H, dh).transpose(0, 2, 1, 3)
    BQ = stack("bq").reshape(L, H, 1, dh)
    BK = stack("bk").reshape(L, H, 1, dh)
    BV = stack("bv").reshape(L, H, 1, dh)
    WO = stack("wo").reshape(L, H, dh, D)                          # (L,H,dh,D)
    BO = stack("bo")                                               # (L,1,D)
    G1, BT1 = stack("g1"), stack("beta1")                          # (L,1,D)
    G2, BT2 = stack("g2"), stack("beta2")
    W1, B1 = stack("w1"), stack("b1")                              # (L,D,F),(L,1,F)
    W2, B2 = stack("w2"), stack("b2")                              # (L,F,D),(L,1,D)
    woutT = params["wout"].T                                       # (Dout, D)

    def full_spec(a):
        zeros = (0,) * a.ndim
        return pl.BlockSpec(a.shape, lambda b: zeros)

    kernel = partial(decoder_kernel, n_head=H, num_layers=L)

    operands = (x, params["we"], params["be"], pe,
                WQ, BQ, WK, BK, WV, BV, WO, BO,
                G1, BT1, W1, B1, W2, B2, G2, BT2,
                woutT, params["bout"])

    in_specs = [pl.BlockSpec((1, S, Din), lambda b: (b, 0, 0))]
    in_specs += [full_spec(a) for a in operands[1:]]

    return pl.pallas_call(
        kernel,
        out_shape=jax.ShapeDtypeStruct((B, S, Dout), jnp.float32),
        grid=(B,),
        in_specs=in_specs,
        out_specs=pl.BlockSpec((1, S, Dout), lambda b: (b, 0, 0)),
        compiler_params=pltpu.CompilerParams(dimension_semantics=("parallel",)),
    )(*operands)


# ----------------------------------------------------------------------------
# Parameter construction (deterministic) and positional encoding
# ----------------------------------------------------------------------------
def make_params(key, input_dim, d_model, ffn_hidden, num_layers):
    def dense(k, din, dout, scale=0.02):
        kw, kb = jax.random.split(k)
        return (scale * jax.random.normal(kw, (din, dout), jnp.float32),
                scale * jax.random.normal(kb, (1, dout), jnp.float32))

    keys = jax.random.split(key, 2 + num_layers)
    we, be = dense(keys[0], input_dim, d_model)
    wout, bout = dense(keys[1], d_model, input_dim)
    layers = []
    for li in range(num_layers):
        lk = jax.random.split(keys[2 + li], 6)
        wq, bq = dense(lk[0], d_model, d_model)
        wk_, bk = dense(lk[1], d_model, d_model)
        wv, bv = dense(lk[2], d_model, d_model)
        wo, bo = dense(lk[3], d_model, d_model)
        w1, b1 = dense(lk[4], d_model, ffn_hidden)
        w2, b2 = dense(lk[5], ffn_hidden, d_model)
        layers.append(dict(
            wq=wq, bq=bq, wk=wk_, bk=bk, wv=wv, bv=bv, wo=wo, bo=bo,
            w1=w1, b1=b1, w2=w2, b2=b2,
            g1=jnp.ones((1, d_model), jnp.float32),
            beta1=jnp.zeros((1, d_model), jnp.float32),
            g2=jnp.ones((1, d_model), jnp.float32),
            beta2=jnp.zeros((1, d_model), jnp.float32),
        ))
    return dict(we=we, be=be, wout=wout, bout=bout, layers=layers)


def sinusoidal_pe(seq_len, d_model):
    pos = jnp.arange(seq_len, dtype=jnp.float32)[:, None]
    i = jnp.arange(0, d_model, 2, dtype=jnp.float32)[None, :]
    angle = pos / jnp.power(10000.0, i / d_model)
    pe = jnp.zeros((seq_len, d_model), jnp.float32)
    pe = pe.at[:, 0::2].set(jnp.sin(angle))
    pe = pe.at[:, 1::2].set(jnp.cos(angle))
    return pe


# ----------------------------------------------------------------------------
# Pure-JAX reference for correctness checking
# ----------------------------------------------------------------------------
def decoder_reference(x, params, n_head):
    x = x[..., None].astype(jnp.float32)
    B, S, _ = x.shape
    d_model = params["we"].shape[1]
    dh = d_model // n_head
    pe = sinusoidal_pe(S, d_model)
    mask = jnp.tril(jnp.ones((S, S), jnp.float32))
    h = x @ params["we"] + params["be"] + pe

    def ln(z, g, b, eps=1e-5):
        mu = z.mean(-1, keepdims=True)
        var = ((z - mu) ** 2).mean(-1, keepdims=True)
        return (z - mu) * jax.lax.rsqrt(var + eps) * g + b

    for p in params["layers"]:
        q = (h @ p["wq"] + p["bq"]).reshape(B, S, n_head, dh).transpose(0, 2, 1, 3)
        k = (h @ p["wk"] + p["bk"]).reshape(B, S, n_head, dh).transpose(0, 2, 1, 3)
        v = (h @ p["wv"] + p["bv"]).reshape(B, S, n_head, dh).transpose(0, 2, 1, 3)
        s = jnp.einsum("bhqd,bhkd->bhqk", q, k) / math.sqrt(dh)
        s = jnp.where(mask == 0, -1e9, s)
        a = jax.nn.softmax(s, axis=-1)
        o = jnp.einsum("bhqk,bhkd->bhqd", a, v).transpose(0, 2, 1, 3).reshape(B, S, d_model)
        o = o @ p["wo"] + p["bo"]
        h = ln(h + o, p["g1"], p["beta1"])
        f = jnp.maximum(h @ p["w1"] + p["b1"], 0.0) @ p["w2"] + p["b2"]
        h = ln(h + f, p["g2"], p["beta2"])
    return h @ params["wout"] + params["bout"]


if __name__ == "__main__":
    # small shapes consistent with the module's forward
    B, S = 2, 8
    input_dim, d_model, n_head, ffn_hidden, num_layers = 1, 32, 4, 64, 2

    key = jax.random.PRNGKey(0)
    kx, kp = jax.random.split(key)
    x = jax.random.normal(kx, (B, S), jnp.float32)          # (batch, seq)
    params = make_params(kp, input_dim, d_model, ffn_hidden, num_layers)

    fwd = jax.jit(partial(decoder_forward, n_head=n_head))
    out = jax.block_until_ready(fwd(x, params))
    assert out.shape == (B, S, input_dim), out.shape

    ref = decoder_reference(x, params, n_head)
    # tolerance slightly looser than exact-f32 because of the approximate
    # (EUP) reciprocal used for the softmax denominator
    assert jnp.allclose(out, ref, rtol=1e-3, atol=1e-3), (
        float(jnp.max(jnp.abs(out - ref)))
    )
    print("KERNEL_OK")
</pallas_src>

<mosaic_0001>
module attributes {stable_mosaic.version = 11 : i64} {
  func.func @decoder_kernel(%arg0: i32, %arg1: memref<1x8x1xf32, #tpu.memory_space<vmem>>, %arg2: memref<1x32xf32, #tpu.memory_space<vmem>>, %arg3: memref<1x32xf32, #tpu.memory_space<vmem>>, %arg4: memref<8x32xf32, #tpu.memory_space<vmem>>, %arg5: memref<2x4x32x8xf32, #tpu.memory_space<vmem>>, %arg6: memref<2x4x1x8xf32, #tpu.memory_space<vmem>>, %arg7: memref<2x4x32x8xf32, #tpu.memory_space<vmem>>, %arg8: memref<2x4x1x8xf32, #tpu.memory_space<vmem>>, %arg9: memref<2x4x32x8xf32, #tpu.memory_space<vmem>>, %arg10: memref<2x4x1x8xf32, #tpu.memory_space<vmem>>, %arg11: memref<2x4x8x32xf32, #tpu.memory_space<vmem>>, %arg12: memref<2x1x32xf32, #tpu.memory_space<vmem>>, %arg13: memref<2x1x32xf32, #tpu.memory_space<vmem>>, %arg14: memref<2x1x32xf32, #tpu.memory_space<vmem>>, %arg15: memref<2x32x64xf32, #tpu.memory_space<vmem>>, %arg16: memref<2x1x64xf32, #tpu.memory_space<vmem>>, %arg17: memref<2x64x32xf32, #tpu.memory_space<vmem>>, %arg18: memref<2x1x32xf32, #tpu.memory_space<vmem>>, %arg19: memref<2x1x32xf32, #tpu.memory_space<vmem>>, %arg20: memref<2x1x32xf32, #tpu.memory_space<vmem>>, %arg21: memref<1x32xf32, #tpu.memory_space<vmem>>, %arg22: memref<1x1xf32, #tpu.memory_space<vmem>>, %arg23: memref<1x8x1xf32, #tpu.memory_space<vmem>>) attributes {dimension_semantics = [#tpu.dimension_semantics<parallel>], iteration_bounds = array<i64: 2>, scalar_prefetch = 0 : i64, scratch_operands = 0 : i64, tpu.core_type = #tpu.core_type<tc>, window_params = [{transform_indices = @transform_0, window_bounds = array<i64: 1, 8, 1>}, {pipeline_mode = #tpu.pipeline_mode<synchronous>, transform_indices = @transform_1, window_bounds = array<i64: 1, 32>}, {pipeline_mode = #tpu.pipeline_mode<synchronous>, transform_indices = @transform_2, window_bounds = array<i64: 1, 32>}, {pipeline_mode = #tpu.pipeline_mode<synchronous>, transform_indices = @transform_3, window_bounds = array<i64: 8, 32>}, {pipeline_mode = #tpu.pipeline_mode<synchronous>, transform_indices = @transform_4, window_bounds = array<i64: 2, 4, 32, 8>}, {pipeline_mode = #tpu.pipeline_mode<synchronous>, transform_indices = @transform_5, window_bounds = array<i64: 2, 4, 1, 8>}, {pipeline_mode = #tpu.pipeline_mode<synchronous>, transform_indices = @transform_6, window_bounds = array<i64: 2, 4, 32, 8>}, {pipeline_mode = #tpu.pipeline_mode<synchronous>, transform_indices = @transform_7, window_bounds = array<i64: 2, 4, 1, 8>}, {pipeline_mode = #tpu.pipeline_mode<synchronous>, transform_indices = @transform_8, window_bounds = array<i64: 2, 4, 32, 8>}, {pipeline_mode = #tpu.pipeline_mode<synchronous>, transform_indices = @transform_9, window_bounds = array<i64: 2, 4, 1, 8>}, {pipeline_mode = #tpu.pipeline_mode<synchronous>, transform_indices = @transform_10, window_bounds = array<i64: 2, 4, 8, 32>}, {pipeline_mode = #tpu.pipeline_mode<synchronous>, transform_indices = @transform_11, window_bounds = array<i64: 2, 1, 32>}, {pipeline_mode = #tpu.pipeline_mode<synchronous>, transform_indices = @transform_12, window_bounds = array<i64: 2, 1, 32>}, {pipeline_mode = #tpu.pipeline_mode<synchronous>, transform_indices = @transform_13, window_bounds = array<i64: 2, 1, 32>}, {pipeline_mode = #tpu.pipeline_mode<synchronous>, transform_indices = @transform_14, window_bounds = array<i64: 2, 32, 64>}, {pipeline_mode = #tpu.pipeline_mode<synchronous>, transform_indices = @transform_15, window_bounds = array<i64: 2, 1, 64>}, {pipeline_mode = #tpu.pipeline_mode<synchronous>, transform_indices = @transform_16, window_bounds = array<i64: 2, 64, 32>}, {pipeline_mode = #tpu.pipeline_mode<synchronous>, transform_indices = @transform_17, window_bounds = array<i64: 2, 1, 32>}, {pipeline_mode = #tpu.pipeline_mode<synchronous>, transform_indices = @transform_18, window_bounds = array<i64: 2, 1, 32>}, {pipeline_mode = #tpu.pipeline_mode<synchronous>, transform_indices = @transform_19, window_bounds = array<i64: 2, 1, 32>}, {pipeline_mode = #tpu.pipeline_mode<synchronous>, transform_indices = @transform_20, window_bounds = array<i64: 1, 32>}, {pipeline_mode = #tpu.pipeline_mode<synchronous>, transform_indices = @transform_21, window_bounds = array<i64: 1, 1>}, {transform_indices = @transform_22, window_bounds = array<i64: 1, 8, 1>}]} {
    %c0 = arith.constant 0 : index
    %c0_0 = arith.constant 0 : index
    %c0_1 = arith.constant 0 : index
    %0 = vector.load %arg1[%c0, %c0_0, %c0_1] : memref<1x8x1xf32, #tpu.memory_space<vmem>>, vector<1x8x1xf32>
    %1 = vector.shape_cast %0 : vector<1x8x1xf32> to vector<8x1xf32>
    %c0_2 = arith.constant 0 : index
    %c0_3 = arith.constant 0 : index
    %2 = vector.load %arg2[%c0_2, %c0_3] : memref<1x32xf32, #tpu.memory_space<vmem>>, vector<1x32xf32>
    %3 = vector.broadcast %1 : vector<8x1xf32> to vector<8x32xf32>
    %4 = vector.broadcast %2 : vector<1x32xf32> to vector<8x32xf32>
    %5 = arith.mulf %3, %4 : vector<8x32xf32>
    %c0_4 = arith.constant 0 : index
    %c0_5 = arith.constant 0 : index
    %6 = vector.load %arg3[%c0_4, %c0_5] : memref<1x32xf32, #tpu.memory_space<vmem>>, vector<1x32xf32>
    %c0_6 = arith.constant 0 : index
    %c0_7 = arith.constant 0 : index
    %7 = vector.load %arg4[%c0_6, %c0_7] : memref<8x32xf32, #tpu.memory_space<vmem>>, vector<8x32xf32>
    %8 = vector.broadcast %6 : vector<1x32xf32> to vector<8x32xf32>
    %9 = arith.addf %8, %7 : vector<8x32xf32>
    %10 = arith.addf %5, %9 : vector<8x32xf32>
    %11 = tpu.iota {dimensions = array<i32: 0>} : vector<8x8xi32>
    %12 = tpu.iota {dimensions = array<i32: 1>} : vector<8x8xi32>
    %13 = arith.cmpi sgt, %12, %11 : vector<8x8xi32>
    %cst = arith.constant -1.000000e+09 : f32
    %cst_8 = arith.constant 0.000000e+00 : f32
    %14 = vector.broadcast %cst : f32 to vector<8x8xf32>
    %15 = vector.broadcast %cst_8 : f32 to vector<8x8xf32>
    %16 = arith.select %13, %14, %15 : vector<8x8xi1>, vector<8x8xf32>
    %c0_9 = arith.constant 0 : index
    %c0_10 = arith.constant 0 : index
    %c0_11 = arith.constant 0 : index
    %c0_12 = arith.constant 0 : index
    %17 = vector.load %arg5[%c0_9, %c0_10, %c0_11, %c0_12] : memref<2x4x32x8xf32, #tpu.memory_space<vmem>>, vector<1x4x32x8xf32>
    %18 = vector.shape_cast %17 : vector<1x4x32x8xf32> to vector<4x32x8xf32>
    %c0_13 = arith.constant 0 : index
    %c0_14 = arith.constant 0 : index
    %c0_15 = arith.constant 0 : index
    %c0_16 = arith.constant 0 : index
    %19 = vector.load %arg6[%c0_13, %c0_14, %c0_15, %c0_16] : memref<2x4x1x8xf32, #tpu.memory_space<vmem>>, vector<1x4x1x8xf32>
    %20 = vector.shape_cast %19 : vector<1x4x1x8xf32> to vector<4x1x8xf32>
    %c0_17 = arith.constant 0 : index
    %c0_18 = arith.constant 0 : index
    %c0_19 = arith.constant 0 : index
    %c0_20 = arith.constant 0 : index
    %21 = vector.load %arg7[%c0_17, %c0_18, %c0_19, %c0_20] : memref<2x4x32x8xf32, #tpu.memory_space<vmem>>, vector<1x4x32x8xf32>
    %22 = vector.shape_cast %21 : vector<1x4x32x8xf32> to vector<4x32x8xf32>
    %c0_21 = arith.constant 0 : index
    %c0_22 = arith.constant 0 : index
    %c0_23 = arith.constant 0 : index
    %c0_24 = arith.constant 0 : index
    %23 = vector.load %arg8[%c0_21, %c0_22, %c0_23, %c0_24] : memref<2x4x1x8xf32, #tpu.memory_space<vmem>>, vector<1x4x1x8xf32>
    %24 = vector.shape_cast %23 : vector<1x4x1x8xf32> to vector<4x1x8xf32>
    %c0_25 = arith.constant 0 : index
    %c0_26 = arith.constant 0 : index
    %c0_27 = arith.constant 0 : index
    %c0_28 = arith.constant 0 : index
    %25 = vector.load %arg9[%c0_25, %c0_26, %c0_27, %c0_28] : memref<2x4x32x8xf32, #tpu.memory_space<vmem>>, vector<1x4x32x8xf32>
    %26 = vector.shape_cast %25 : vector<1x4x32x8xf32> to vector<4x32x8xf32>
    %c0_29 = arith.constant 0 : index
    %c0_30 = arith.constant 0 : index
    %c0_31 = arith.constant 0 : index
    %c0_32 = arith.constant 0 : index
    %27 = vector.load %arg10[%c0_29, %c0_30, %c0_31, %c0_32] : memref<2x4x1x8xf32, #tpu.memory_space<vmem>>, vector<1x4x1x8xf32>
    %28 = vector.shape_cast %27 : vector<1x4x1x8xf32> to vector<4x1x8xf32>
    %c0_33 = arith.constant 0 : index
    %c0_34 = arith.constant 0 : index
    %c0_35 = arith.constant 0 : index
    %c0_36 = arith.constant 0 : index
    %29 = vector.load %arg11[%c0_33, %c0_34, %c0_35, %c0_36] : memref<2x4x8x32xf32, #tpu.memory_space<vmem>>, vector<1x4x8x32xf32>
    %30 = vector.shape_cast %29 : vector<1x4x8x32xf32> to vector<4x8x32xf32>
    %c0_37 = arith.constant 0 : index
    %c0_38 = arith.constant 0 : index
    %c0_39 = arith.constant 0 : index
    %31 = vector.load %arg12[%c0_37, %c0_38, %c0_39] : memref<2x1x32xf32, #tpu.memory_space<vmem>>, vector<1x1x32xf32>
    %32 = vector.shape_cast %31 : vector<1x1x32xf32> to vector<1x32xf32>
    %33 = vector.shape_cast %10 : vector<8x32xf32> to vector<1x8x32xf32>
    %34 = vector.broadcast %33 : vector<1x8x32xf32> to vector<4x8x32xf32>
    %cst_40 = arith.constant dense<0.000000e+00> : vector<4x8x8xf32>
    %35 = tpu.matmul %34, %18, %cst_40 {dimension_numbers = #tpu.dot_dimension_numbers<[2], [1], [1], [2], [0, 0, 0, 1, 1, 2], [0], [0]>} : vector<4x8x32xf32>, vector<4x32x8xf32>, vector<4x8x8xf32> -> vector<4x8x8xf32>
    %36 = vector.broadcast %20 : vector<4x1x8xf32> to vector<4x8x8xf32>
    %37 = arith.addf %35, %36 : vector<4x8x8xf32>
    %cst_41 = arith.constant dense<0.000000e+00> : vector<4x8x8xf32>
    %38 = tpu.matmul %34, %22, %cst_41 {dimension_numbers = #tpu.dot_dimension_numbers<[2], [1], [1], [2], [0, 0, 0, 1, 1, 2], [0], [0]>} : vector<4x8x32xf32>, vector<4x32x8xf32>, vector<4x8x8xf32> -> vector<4x8x8xf32>
    %39 = vector.broadcast %24 : vector<4x1x8xf32> to vector<4x8x8xf32>
    %40 = arith.addf %38, %39 : vector<4x8x8xf32>
    %cst_42 = arith.constant dense<0.000000e+00> : vector<4x8x8xf32>
    %41 = tpu.matmul %34, %26, %cst_42 {dimension_numbers = #tpu.dot_dimension_numbers<[2], [1], [1], [2], [0, 0, 0, 1, 1, 2], [0], [0]>} : vector<4x8x32xf32>, vector<4x32x8xf32>, vector<4x8x8xf32> -> vector<4x8x8xf32>
    %42 = vector.broadcast %28 : vector<4x1x8xf32> to vector<4x8x8xf32>
    %43 = arith.addf %41, %42 : vector<4x8x8xf32>
    %cst_43 = arith.constant dense<0.000000e+00> : vector<4x8x8xf32>
    %44 = tpu.matmul %37, %40, %cst_43 {dimension_numbers = #tpu.dot_dimension_numbers<[2], [2], [1], [1], [0, 0, 0, 1, 1, 1], [0], [0]>} : vector<4x8x8xf32>, vector<4x8x8xf32>, vector<4x8x8xf32> -> vector<4x8x8xf32>
    %cst_44 = arith.constant 0.353553385 : f32
    %45 = vector.broadcast %cst_44 : f32 to vector<4x8x8xf32>
    %46 = arith.mulf %44, %45 : vector<4x8x8xf32>
    %47 = vector.shape_cast %16 : vector<8x8xf32> to vector<1x8x8xf32>
    %48 = vector.broadcast %47 : vector<1x8x8xf32> to vector<4x8x8xf32>
    %49 = arith.addf %46, %48 : vector<4x8x8xf32>
    %cst_45 = arith.constant dense<0xFF800000> : vector<4x8xf32>
    %50 = vector.multi_reduction <maximumf>, %49, %cst_45 [2] : vector<4x8x8xf32> to vector<4x8xf32>
    %51 = vector.shape_cast %50 : vector<4x8xf32> to vector<4x8x1xf32>
    %52 = vector.broadcast %51 : vector<4x8x1xf32> to vector<4x8x8xf32>
    %53 = arith.subf %49, %52 : vector<4x8x8xf32>
    %54 = math.exp %53 : vector<4x8x8xf32>
    %cst_46 = arith.constant dense<0.000000e+00> : vector<4x8xf32>
    %55 = vector.multi_reduction <add>, %54, %cst_46 [2] : vector<4x8x8xf32> to vector<4x8xf32>
    %56 = vector.shape_cast %55 : vector<4x8xf32> to vector<4x8x1xf32>
    %57 = tpu.reciprocal %56 {approx = true} : vector<4x8x1xf32> -> vector<4x8x1xf32>
    %58 = vector.broadcast %57 : vector<4x8x1xf32> to vector<4x8x8xf32>
    %59 = arith.mulf %54, %58 : vector<4x8x8xf32>
    %cst_47 = arith.constant dense<0.000000e+00> : vector<4x8x8xf32>
    %60 = tpu.matmul %59, %43, %cst_47 {dimension_numbers = #tpu.dot_dimension_numbers<[2], [1], [1], [2], [0, 0, 0, 1, 1, 2], [0], [0]>} : vector<4x8x8xf32>, vector<4x8x8xf32>, vector<4x8x8xf32> -> vector<4x8x8xf32>
    %cst_48 = arith.constant dense<0.000000e+00> : vector<4x8x32xf32>
    %61 = tpu.matmul %60, %30, %cst_48 {dimension_numbers = #tpu.dot_dimension_numbers<[2], [1], [1], [2], [0, 0, 0, 1, 1, 2], [0], [0]>} : vector<4x8x8xf32>, vector<4x8x32xf32>, vector<4x8x32xf32> -> vector<4x8x32xf32>
    %cst_49 = arith.constant dense<0.000000e+00> : vector<8x32xf32>
    %62 = vector.multi_reduction <add>, %61, %cst_49 [0] : vector<4x8x32xf32> to vector<8x32xf32>
    %63 = vector.broadcast %32 : vector<1x32xf32> to vector<8x32xf32>
    %64 = arith.addf %62, %63 : vector<8x32xf32>
    %65 = arith.addf %10, %64 : vector<8x32xf32>
    %c0_50 = arith.constant 0 : index
    %c0_51 = arith.constant 0 : index
    %c0_52 = arith.constant 0 : index
    %66 = vector.load %arg13[%c0_50, %c0_51, %c0_52] : memref<2x1x32xf32, #tpu.memory_space<vmem>>, vector<1x1x32xf32>
    %67 = vector.shape_cast %66 : vector<1x1x32xf32> to vector<1x32xf32>
    %c0_53 = arith.constant 0 : index
    %c0_54 = arith.constant 0 : index
    %c0_55 = arith.constant 0 : index
    %68 = vector.load %arg14[%c0_53, %c0_54, %c0_55] : memref<2x1x32xf32, #tpu.memory_space<vmem>>, vector<1x1x32xf32>
    %69 = vector.shape_cast %68 : vector<1x1x32xf32> to vector<1x32xf32>
    %cst_56 = arith.constant dense<0.000000e+00> : vector<8xf32>
    %70 = vector.multi_reduction <add>, %65, %cst_56 [1] : vector<8x32xf32> to vector<8xf32>
    %71 = vector.shape_cast %70 : vector<8xf32> to vector<8x1xf32>
    %cst_57 = arith.constant 3.200000e+01 : f32
    %72 = vector.broadcast %cst_57 : f32 to vector<8x1xf32>
    %73 = arith.divf %71, %72 : vector<8x1xf32>
    %74 = vector.broadcast %73 : vector<8x1xf32> to vector<8x32xf32>
    %75 = arith.subf %65, %74 : vector<8x32xf32>
    %76 = arith.mulf %75, %75 : vector<8x32xf32>
    %cst_58 = arith.constant dense<0.000000e+00> : vector<8xf32>
    %77 = vector.multi_reduction <add>, %76, %cst_58 [1] : vector<8x32xf32> to vector<8xf32>
    %78 = vector.shape_cast %77 : vector<8xf32> to vector<8x1xf32>
    %cst_59 = arith.constant 3.200000e+01 : f32
    %79 = vector.broadcast %cst_59 : f32 to vector<8x1xf32>
    %80 = arith.divf %78, %79 : vector<8x1xf32>
    %81 = vector.broadcast %73 : vector<8x1xf32> to vector<8x32xf32>
    %82 = arith.subf %65, %81 : vector<8x32xf32>
    %cst_60 = arith.constant 9.99999974E-6 : f32
    %83 = vector.broadcast %cst_60 : f32 to vector<8x1xf32>
    %84 = arith.addf %80, %83 : vector<8x1xf32>
    %85 = math.rsqrt %84 : vector<8x1xf32>
    %86 = vector.broadcast %85 : vector<8x1xf32> to vector<8x32xf32>
    %87 = arith.mulf %82, %86 : vector<8x32xf32>
    %88 = vector.broadcast %67 : vector<1x32xf32> to vector<8x32xf32>
    %89 = arith.mulf %87, %88 : vector<8x32xf32>
    %90 = vector.broadcast %69 : vector<1x32xf32> to vector<8x32xf32>
    %91 = arith.addf %89, %90 : vector<8x32xf32>
    %c0_61 = arith.constant 0 : index
    %c0_62 = arith.constant 0 : index
    %c0_63 = arith.constant 0 : index
    %92 = vector.load %arg15[%c0_61, %c0_62, %c0_63] : memref<2x32x64xf32, #tpu.memory_space<vmem>>, vector<1x32x64xf32>
    %93 = vector.shape_cast %92 : vector<1x32x64xf32> to vector<32x64xf32>
    %cst_64 = arith.constant dense<0.000000e+00> : vector<8x64xf32>
    %94 = tpu.matmul %91, %93, %cst_64 {dimension_numbers = #tpu.dot_dimension_numbers<[1], [0], [0], [1], [0, 0, 1, 1], [], []>} : vector<8x32xf32>, vector<32x64xf32>, vector<8x64xf32> -> vector<8x64xf32>
    %c0_65 = arith.constant 0 : index
    %c0_66 = arith.constant 0 : index
    %c0_67 = arith.constant 0 : index
    %95 = vector.load %arg16[%c0_65, %c0_66, %c0_67] : memref<2x1x64xf32, #tpu.memory_space<vmem>>, vector<1x1x64xf32>
    %96 = vector.shape_cast %95 : vector<1x1x64xf32> to vector<1x64xf32>
    %97 = vector.broadcast %96 : vector<1x64xf32> to vector<8x64xf32>
    %98 = arith.addf %94, %97 : vector<8x64xf32>
    %cst_68 = arith.constant 0.000000e+00 : f32
    %99 = vector.broadcast %cst_68 : f32 to vector<8x64xf32>
    %100 = arith.maximumf %98, %99 : vector<8x64xf32>
    %c0_69 = arith.constant 0 : index
    %c0_70 = arith.constant 0 : index
    %c0_71 = arith.constant 0 : index
    %101 = vector.load %arg17[%c0_69, %c0_70, %c0_71] : memref<2x64x32xf32, #tpu.memory_space<vmem>>, vector<1x64x32xf32>
    %102 = vector.shape_cast %101 : vector<1x64x32xf32> to vector<64x32xf32>
    %cst_72 = arith.constant dense<0.000000e+00> : vector<8x32xf32>
    %103 = tpu.matmul %100, %102, %cst_72 {dimension_numbers = #tpu.dot_dimension_numbers<[1], [0], [0], [1], [0, 0, 1, 1], [], []>} : vector<8x64xf32>, vector<64x32xf32>, vector<8x32xf32> -> vector<8x32xf32>
    %c0_73 = arith.constant 0 : index
    %c0_74 = arith.constant 0 : index
    %c0_75 = arith.constant 0 : index
    %104 = vector.load %arg18[%c0_73, %c0_74, %c0_75] : memref<2x1x32xf32, #tpu.memory_space<vmem>>, vector<1x1x32xf32>
    %105 = vector.shape_cast %104 : vector<1x1x32xf32> to vector<1x32xf32>
    %106 = vector.broadcast %105 : vector<1x32xf32> to vector<8x32xf32>
    %107 = arith.addf %103, %106 : vector<8x32xf32>
    %108 = arith.addf %91, %107 : vector<8x32xf32>
    %c0_76 = arith.constant 0 : index
    %c0_77 = arith.constant 0 : index
    %c0_78 = arith.constant 0 : index
    %109 = vector.load %arg19[%c0_76, %c0_77, %c0_78] : memref<2x1x32xf32, #tpu.memory_space<vmem>>, vector<1x1x32xf32>
    %110 = vector.shape_cast %109 : vector<1x1x32xf32> to vector<1x32xf32>
    %c0_79 = arith.constant 0 : index
    %c0_80 = arith.constant 0 : index
    %c0_81 = arith.constant 0 : index
    %111 = vector.load %arg20[%c0_79, %c0_80, %c0_81] : memref<2x1x32xf32, #tpu.memory_space<vmem>>, vector<1x1x32xf32>
    %112 = vector.shape_cast %111 : vector<1x1x32xf32> to vector<1x32xf32>
    %cst_82 = arith.constant dense<0.000000e+00> : vector<8xf32>
    %113 = vector.multi_reduction <add>, %108, %cst_82 [1] : vector<8x32xf32> to vector<8xf32>
    %114 = vector.shape_cast %113 : vector<8xf32> to vector<8x1xf32>
    %cst_83 = arith.constant 3.200000e+01 : f32
    %115 = vector.broadcast %cst_83 : f32 to vector<8x1xf32>
    %116 = arith.divf %114, %115 : vector<8x1xf32>
    %117 = vector.broadcast %116 : vector<8x1xf32> to vector<8x32xf32>
    %118 = arith.subf %108, %117 : vector<8x32xf32>
    %119 = arith.mulf %118, %118 : vector<8x32xf32>
    %cst_84 = arith.constant dense<0.000000e+00> : vector<8xf32>
    %120 = vector.multi_reduction <add>, %119, %cst_84 [1] : vector<8x32xf32> to vector<8xf32>
    %121 = vector.shape_cast %120 : vector<8xf32> to vector<8x1xf32>
    %cst_85 = arith.constant 3.200000e+01 : f32
    %122 = vector.broadcast %cst_85 : f32 to vector<8x1xf32>
    %123 = arith.divf %121, %122 : vector<8x1xf32>
    %124 = vector.broadcast %116 : vector<8x1xf32> to vector<8x32xf32>
    %125 = arith.subf %108, %124 : vector<8x32xf32>
    %cst_86 = arith.constant 9.99999974E-6 : f32
    %126 = vector.broadcast %cst_86 : f32 to vector<8x1xf32>
    %127 = arith.addf %123, %126 : vector<8x1xf32>
    %128 = math.rsqrt %127 : vector<8x1xf32>
    %129 = vector.broadcast %128 : vector<8x1xf32> to vector<8x32xf32>
    %130 = arith.mulf %125, %129 : vector<8x32xf32>
    %131 = vector.broadcast %110 : vector<1x32xf32> to vector<8x32xf32>
    %132 = arith.mulf %130, %131 : vector<8x32xf32>
    %133 = vector.broadcast %112 : vector<1x32xf32> to vector<8x32xf32>
    %134 = arith.addf %132, %133 : vector<8x32xf32>
    %c1 = arith.constant 1 : index
    %c0_87 = arith.constant 0 : index
    %c0_88 = arith.constant 0 : index
    %c0_89 = arith.constant 0 : index
    %135 = vector.load %arg5[%c1, %c0_87, %c0_88, %c0_89] : memref<2x4x32x8xf32, #tpu.memory_space<vmem>>, vector<1x4x32x8xf32>
    %136 = vector.shape_cast %135 : vector<1x4x32x8xf32> to vector<4x32x8xf32>
    %c1_90 = arith.constant 1 : index
    %c0_91 = arith.constant 0 : index
    %c0_92 = arith.constant 0 : index
    %c0_93 = arith.constant 0 : index
    %137 = vector.load %arg6[%c1_90, %c0_91, %c0_92, %c0_93] : memref<2x4x1x8xf32, #tpu.memory_space<vmem>>, vector<1x4x1x8xf32>
    %138 = vector.shape_cast %137 : vector<1x4x1x8xf32> to vector<4x1x8xf32>
    %c1_94 = arith.constant 1 : index
    %c0_95 = arith.constant 0 : index
    %c0_96 = arith.constant 0 : index
    %c0_97 = arith.constant 0 : index
    %139 = vector.load %arg7[%c1_94, %c0_95, %c0_96, %c0_97] : memref<2x4x32x8xf32, #tpu.memory_space<vmem>>, vector<1x4x32x8xf32>
    %140 = vector.shape_cast %139 : vector<1x4x32x8xf32> to vector<4x32x8xf32>
    %c1_98 = arith.constant 1 : index
    %c0_99 = arith.constant 0 : index
    %c0_100 = arith.constant 0 : index
    %c0_101 = arith.constant 0 : index
    %141 = vector.load %arg8[%c1_98, %c0_99, %c0_100, %c0_101] : memref<2x4x1x8xf32, #tpu.memory_space<vmem>>, vector<1x4x1x8xf32>
    %142 = vector.shape_cast %141 : vector<1x4x1x8xf32> to vector<4x1x8xf32>
    %c1_102 = arith.constant 1 : index
    %c0_103 = arith.constant 0 : index
    %c0_104 = arith.constant 0 : index
    %c0_105 = arith.constant 0 : index
    %143 = vector.load %arg9[%c1_102, %c0_103, %c0_104, %c0_105] : memref<2x4x32x8xf32, #tpu.memory_space<vmem>>, vector<1x4x32x8xf32>
    %144 = vector.shape_cast %143 : vector<1x4x32x8xf32> to vector<4x32x8xf32>
    %c1_106 = arith.constant 1 : index
    %c0_107 = arith.constant 0 : index
    %c0_108 = arith.constant 0 : index
    %c0_109 = arith.constant 0 : index
    %145 = vector.load %arg10[%c1_106, %c0_107, %c0_108, %c0_109] : memref<2x4x1x8xf32, #tpu.memory_space<vmem>>, vector<1x4x1x8xf32>
    %146 = vector.shape_cast %145 : vector<1x4x1x8xf32> to vector<4x1x8xf32>
    %c1_110 = arith.constant 1 : index
    %c0_111 = arith.constant 0 : index
    %c0_112 = arith.constant 0 : index
    %c0_113 = arith.constant 0 : index
    %147 = vector.load %arg11[%c1_110, %c0_111, %c0_112, %c0_113] : memref<2x4x8x32xf32, #tpu.memory_space<vmem>>, vector<1x4x8x32xf32>
    %148 = vector.shape_cast %147 : vector<1x4x8x32xf32> to vector<4x8x32xf32>
    %c1_114 = arith.constant 1 : index
    %c0_115 = arith.constant 0 : index
    %c0_116 = arith.constant 0 : index
    %149 = vector.load %arg12[%c1_114, %c0_115, %c0_116] : memref<2x1x32xf32, #tpu.memory_space<vmem>>, vector<1x1x32xf32>
    %150 = vector.shape_cast %149 : vector<1x1x32xf32> to vector<1x32xf32>
    %151 = vector.shape_cast %134 : vector<8x32xf32> to vector<1x8x32xf32>
    %152 = vector.broadcast %151 : vector<1x8x32xf32> to vector<4x8x32xf32>
    %cst_117 = arith.constant dense<0.000000e+00> : vector<4x8x8xf32>
    %153 = tpu.matmul %152, %136, %cst_117 {dimension_numbers = #tpu.dot_dimension_numbers<[2], [1], [1], [2], [0, 0, 0, 1, 1, 2], [0], [0]>} : vector<4x8x32xf32>, vector<4x32x8xf32>, vector<4x8x8xf32> -> vector<4x8x8xf32>
    %154 = vector.broadcast %138 : vector<4x1x8xf32> to vector<4x8x8xf32>
    %155 = arith.addf %153, %154 : vector<4x8x8xf32>
    %cst_118 = arith.constant dense<0.000000e+00> : vector<4x8x8xf32>
    %156 = tpu.matmul %152, %140, %cst_118 {dimension_numbers = #tpu.dot_dimension_numbers<[2], [1], [1], [2], [0, 0, 0, 1, 1, 2], [0], [0]>} : vector<4x8x32xf32>, vector<4x32x8xf32>, vector<4x8x8xf32> -> vector<4x8x8xf32>
    %157 = vector.broadcast %142 : vector<4x1x8xf32> to vector<4x8x8xf32>
    %158 = arith.addf %156, %157 : vector<4x8x8xf32>
    %cst_119 = arith.constant dense<0.000000e+00> : vector<4x8x8xf32>
    %159 = tpu.matmul %152, %144, %cst_119 {dimension_numbers = #tpu.dot_dimension_numbers<[2], [1], [1], [2], [0, 0, 0, 1, 1, 2], [0], [0]>} : vector<4x8x32xf32>, vector<4x32x8xf32>, vector<4x8x8xf32> -> vector<4x8x8xf32>
    %160 = vector.broadcast %146 : vector<4x1x8xf32> to vector<4x8x8xf32>
    %161 = arith.addf %159, %160 : vector<4x8x8xf32>
    %cst_120 = arith.constant dense<0.000000e+00> : vector<4x8x8xf32>
    %162 = tpu.matmul %155, %158, %cst_120 {dimension_numbers = #tpu.dot_dimension_numbers<[2], [2], [1], [1], [0, 0, 0, 1, 1, 1], [0], [0]>} : vector<4x8x8xf32>, vector<4x8x8xf32>, vector<4x8x8xf32> -> vector<4x8x8xf32>
    %cst_121 = arith.constant 0.353553385 : f32
    %163 = vector.broadcast %cst_121 : f32 to vector<4x8x8xf32>
    %164 = arith.mulf %162, %163 : vector<4x8x8xf32>
    %165 = vector.shape_cast %16 : vector<8x8xf32> to vector<1x8x8xf32>
    %166 = vector.broadcast %165 : vector<1x8x8xf32> to vector<4x8x8xf32>
    %167 = arith.addf %164, %166 : vector<4x8x8xf32>
    %cst_122 = arith.constant dense<0xFF800000> : vector<4x8xf32>
    %168 = vector.multi_reduction <maximumf>, %167, %cst_122 [2] : vector<4x8x8xf32> to vector<4x8xf32>
    %169 = vector.shape_cast %168 : vector<4x8xf32> to vector<4x8x1xf32>
    %170 = vector.broadcast %169 : vector<4x8x1xf32> to vector<4x8x8xf32>
    %171 = arith.subf %167, %170 : vector<4x8x8xf32>
    %172 = math.exp %171 : vector<4x8x8xf32>
    %cst_123 = arith.constant dense<0.000000e+00> : vector<4x8xf32>
    %173 = vector.multi_reduction <add>, %172, %cst_123 [2] : vector<4x8x8xf32> to vector<4x8xf32>
    %174 = vector.shape_cast %173 : vector<4x8xf32> to vector<4x8x1xf32>
    %175 = tpu.reciprocal %174 {approx = true} : vector<4x8x1xf32> -> vector<4x8x1xf32>
    %176 = vector.broadcast %175 : vector<4x8x1xf32> to vector<4x8x8xf32>
    %177 = arith.mulf %172, %176 : vector<4x8x8xf32>
    %cst_124 = arith.constant dense<0.000000e+00> : vector<4x8x8xf32>
    %178 = tpu.matmul %177, %161, %cst_124 {dimension_numbers = #tpu.dot_dimension_numbers<[2], [1], [1], [2], [0, 0, 0, 1, 1, 2], [0], [0]>} : vector<4x8x8xf32>, vector<4x8x8xf32>, vector<4x8x8xf32> -> vector<4x8x8xf32>
    %cst_125 = arith.constant dense<0.000000e+00> : vector<4x8x32xf32>
    %179 = tpu.matmul %178, %148, %cst_125 {dimension_numbers = #tpu.dot_dimension_numbers<[2], [1], [1], [2], [0, 0, 0, 1, 1, 2], [0], [0]>} : vector<4x8x8xf32>, vector<4x8x32xf32>, vector<4x8x32xf32> -> vector<4x8x32xf32>
    %cst_126 = arith.constant dense<0.000000e+00> : vector<8x32xf32>
    %180 = vector.multi_reduction <add>, %179, %cst_126 [0] : vector<4x8x32xf32> to vector<8x32xf32>
    %181 = vector.broadcast %150 : vector<1x32xf32> to vector<8x32xf32>
    %182 = arith.addf %180, %181 : vector<8x32xf32>
    %183 = arith.addf %134, %182 : vector<8x32xf32>
    %c1_127 = arith.constant 1 : index
    %c0_128 = arith.constant 0 : index
    %c0_129 = arith.constant 0 : index
    %184 = vector.load %arg13[%c1_127, %c0_128, %c0_129] : memref<2x1x32xf32, #tpu.memory_space<vmem>>, vector<1x1x32xf32>
    %185 = vector.shape_cast %184 : vector<1x1x32xf32> to vector<1x32xf32>
    %c1_130 = arith.constant 1 : index
    %c0_131 = arith.constant 0 : index
    %c0_132 = arith.constant 0 : index
    %186 = vector.load %arg14[%c1_130, %c0_131, %c0_132] : memref<2x1x32xf32, #tpu.memory_space<vmem>>, vector<1x1x32xf32>
    %187 = vector.shape_cast %186 : vector<1x1x32xf32> to vector<1x32xf32>
    %cst_133 = arith.constant dense<0.000000e+00> : vector<8xf32>
    %188 = vector.multi_reduction <add>, %183, %cst_133 [1] : vector<8x32xf32> to vector<8xf32>
    %189 = vector.shape_cast %188 : vector<8xf32> to vector<8x1xf32>
    %cst_134 = arith.constant 3.200000e+01 : f32
    %190 = vector.broadcast %cst_134 : f32 to vector<8x1xf32>
    %191 = arith.divf %189, %190 : vector<8x1xf32>
    %192 = vector.broadcast %191 : vector<8x1xf32> to vector<8x32xf32>
    %193 = arith.subf %183, %192 : vector<8x32xf32>
    %194 = arith.mulf %193, %193 : vector<8x32xf32>
    %cst_135 = arith.constant dense<0.000000e+00> : vector<8xf32>
    %195 = vector.multi_reduction <add>, %194, %cst_135 [1] : vector<8x32xf32> to vector<8xf32>
    %196 = vector.shape_cast %195 : vector<8xf32> to vector<8x1xf32>
    %cst_136 = arith.constant 3.200000e+01 : f32
    %197 = vector.broadcast %cst_136 : f32 to vector<8x1xf32>
    %198 = arith.divf %196, %197 : vector<8x1xf32>
    %199 = vector.broadcast %191 : vector<8x1xf32> to vector<8x32xf32>
    %200 = arith.subf %183, %199 : vector<8x32xf32>
    %cst_137 = arith.constant 9.99999974E-6 : f32
    %201 = vector.broadcast %cst_137 : f32 to vector<8x1xf32>
    %202 = arith.addf %198, %201 : vector<8x1xf32>
    %203 = math.rsqrt %202 : vector<8x1xf32>
    %204 = vector.broadcast %203 : vector<8x1xf32> to vector<8x32xf32>
    %205 = arith.mulf %200, %204 : vector<8x32xf32>
    %206 = vector.broadcast %185 : vector<1x32xf32> to vector<8x32xf32>
    %207 = arith.mulf %205, %206 : vector<8x32xf32>
    %208 = vector.broadcast %187 : vector<1x32xf32> to vector<8x32xf32>
    %209 = arith.addf %207, %208 : vector<8x32xf32>
    %c1_138 = arith.constant 1 : index
    %c0_139 = arith.constant 0 : index
    %c0_140 = arith.constant 0 : index
    %210 = vector.load %arg15[%c1_138, %c0_139, %c0_140] : memref<2x32x64xf32, #tpu.memory_space<vmem>>, vector<1x32x64xf32>
    %211 = vector.shape_cast %210 : vector<1x32x64xf32> to vector<32x64xf32>
    %cst_141 = arith.constant dense<0.000000e+00> : vector<8x64xf32>
    %212 = tpu.matmul %209, %211, %cst_141 {dimension_numbers = #tpu.dot_dimension_numbers<[1], [0], [0], [1], [0, 0, 1, 1], [], []>} : vector<8x32xf32>, vector<32x64xf32>, vector<8x64xf32> -> vector<8x64xf32>
    %c1_142 = arith.constant 1 : index
    %c0_143 = arith.constant 0 : index
    %c0_144 = arith.constant 0 : index
    %213 = vector.load %arg16[%c1_142, %c0_143, %c0_144] : memref<2x1x64xf32, #tpu.memory_space<vmem>>, vector<1x1x64xf32>
    %214 = vector.shape_cast %213 : vector<1x1x64xf32> to vector<1x64xf32>
    %215 = vector.broadcast %214 : vector<1x64xf32> to vector<8x64xf32>
    %216 = arith.addf %212, %215 : vector<8x64xf32>
    %cst_145 = arith.constant 0.000000e+00 : f32
    %217 = vector.broadcast %cst_145 : f32 to vector<8x64xf32>
    %218 = arith.maximumf %216, %217 : vector<8x64xf32>
    %c1_146 = arith.constant 1 : index
    %c0_147 = arith.constant 0 : index
    %c0_148 = arith.constant 0 : index
    %219 = vector.load %arg17[%c1_146, %c0_147, %c0_148] : memref<2x64x32xf32, #tpu.memory_space<vmem>>, vector<1x64x32xf32>
    %220 = vector.shape_cast %219 : vector<1x64x32xf32> to vector<64x32xf32>
    %cst_149 = arith.constant dense<0.000000e+00> : vector<8x32xf32>
    %221 = tpu.matmul %218, %220, %cst_149 {dimension_numbers = #tpu.dot_dimension_numbers<[1], [0], [0], [1], [0, 0, 1, 1], [], []>} : vector<8x64xf32>, vector<64x32xf32>, vector<8x32xf32> -> vector<8x32xf32>
    %c1_150 = arith.constant 1 : index
    %c0_151 = arith.constant 0 : index
    %c0_152 = arith.constant 0 : index
    %222 = vector.load %arg18[%c1_150, %c0_151, %c0_152] : memref<2x1x32xf32, #tpu.memory_space<vmem>>, vector<1x1x32xf32>
    %223 = vector.shape_cast %222 : vector<1x1x32xf32> to vector<1x32xf32>
    %224 = vector.broadcast %223 : vector<1x32xf32> to vector<8x32xf32>
    %225 = arith.addf %221, %224 : vector<8x32xf32>
    %226 = arith.addf %209, %225 : vector<8x32xf32>
    %c1_153 = arith.constant 1 : index
    %c0_154 = arith.constant 0 : index
    %c0_155 = arith.constant 0 : index
    %227 = vector.load %arg19[%c1_153, %c0_154, %c0_155] : memref<2x1x32xf32, #tpu.memory_space<vmem>>, vector<1x1x32xf32>
    %228 = vector.shape_cast %227 : vector<1x1x32xf32> to vector<1x32xf32>
    %c1_156 = arith.constant 1 : index
    %c0_157 = arith.constant 0 : index
    %c0_158 = arith.constant 0 : index
    %229 = vector.load %arg20[%c1_156, %c0_157, %c0_158] : memref<2x1x32xf32, #tpu.memory_space<vmem>>, vector<1x1x32xf32>
    %230 = vector.shape_cast %229 : vector<1x1x32xf32> to vector<1x32xf32>
    %cst_159 = arith.constant dense<0.000000e+00> : vector<8xf32>
    %231 = vector.multi_reduction <add>, %226, %cst_159 [1] : vector<8x32xf32> to vector<8xf32>
    %232 = vector.shape_cast %231 : vector<8xf32> to vector<8x1xf32>
    %cst_160 = arith.constant 3.200000e+01 : f32
    %233 = vector.broadcast %cst_160 : f32 to vector<8x1xf32>
    %234 = arith.divf %232, %233 : vector<8x1xf32>
    %235 = vector.broadcast %234 : vector<8x1xf32> to vector<8x32xf32>
    %236 = arith.subf %226, %235 : vector<8x32xf32>
    %237 = arith.mulf %236, %236 : vector<8x32xf32>
    %cst_161 = arith.constant dense<0.000000e+00> : vector<8xf32>
    %238 = vector.multi_reduction <add>, %237, %cst_161 [1] : vector<8x32xf32> to vector<8xf32>
    %239 = vector.shape_cast %238 : vector<8xf32> to vector<8x1xf32>
    %cst_162 = arith.constant 3.200000e+01 : f32
    %240 = vector.broadcast %cst_162 : f32 to vector<8x1xf32>
    %241 = arith.divf %239, %240 : vector<8x1xf32>
    %242 = vector.broadcast %234 : vector<8x1xf32> to vector<8x32xf32>
    %243 = arith.subf %226, %242 : vector<8x32xf32>
    %cst_163 = arith.constant 9.99999974E-6 : f32
    %244 = vector.broadcast %cst_163 : f32 to vector<8x1xf32>
    %245 = arith.addf %241, %244 : vector<8x1xf32>
    %246 = math.rsqrt %245 : vector<8x1xf32>
    %247 = vector.broadcast %246 : vector<8x1xf32> to vector<8x32xf32>
    %248 = arith.mulf %243, %247 : vector<8x32xf32>
    %249 = vector.broadcast %228 : vector<1x32xf32> to vector<8x32xf32>
    %250 = arith.mulf %248, %249 : vector<8x32xf32>
    %251 = vector.broadcast %230 : vector<1x32xf32> to vector<8x32xf32>
    %252 = arith.addf %250, %251 : vector<8x32xf32>
    %c0_164 = arith.constant 0 : index
    %c0_165 = arith.constant 0 : index
    %253 = vector.load %arg21[%c0_164, %c0_165] : memref<1x32xf32, #tpu.memory_space<vmem>>, vector<1x32xf32>
    %254 = vector.broadcast %253 : vector<1x32xf32> to vector<8x32xf32>
    %255 = arith.mulf %252, %254 : vector<8x32xf32>
    %cst_166 = arith.constant dense<0.000000e+00> : vector<8xf32>
    %256 = vector.multi_reduction <add>, %255, %cst_166 [1] : vector<8x32xf32> to vector<8xf32>
    %257 = vector.shape_cast %256 : vector<8xf32> to vector<8x1xf32>
    %c0_167 = arith.constant 0 : index
    %c0_168 = arith.constant 0 : index
    %258 = vector.load %arg22[%c0_167, %c0_168] : memref<1x1xf32, #tpu.memory_space<vmem>>, vector<1x1xf32>
    %259 = vector.broadcast %258 : vector<1x1xf32> to vector<8x1xf32>
    %260 = arith.addf %257, %259 : vector<8x1xf32>
    %c0_169 = arith.constant 0 : index
    %c0_170 = arith.constant 0 : index
    %c0_171 = arith.constant 0 : index
    %261 = vector.load %arg23[%c0_169, %c0_170, %c0_171] : memref<1x8x1xf32, #tpu.memory_space<vmem>>, vector<1x8x1xf32>
    %262 = vector.shape_cast %261 : vector<1x8x1xf32> to vector<8x1xf32>
    %263 = vector.shape_cast %260 : vector<8x1xf32> to vector<1x8x1xf32>
    tpu.vector_store %arg23[%c0_169, %c0_170, %c0_171], %263 {strides = array<i32>} : memref<1x8x1xf32, #tpu.memory_space<vmem>>, vector<1x8x1xf32>,
    return
  }
  func.func @transform_0(%arg0: i32) -> (i32, i32, i32) {
    %c0_i32 = arith.constant 0 : i32
    %c0_i32_0 = arith.constant 0 : i32
    %c0_i32_1 = arith.constant 0 : i32
    return %arg0, %c0_i32, %c0_i32_0 : i32, i32, i32
  }
  func.func @transform_1(%arg0: i32) -> (i32, i32) {
    %c0_i32 = arith.constant 0 : i32
    %c0_i32_0 = arith.constant 0 : i32
    %c0_i32_1 = arith.constant 0 : i32
    return %c0_i32, %c0_i32_0 : i32, i32
  }
  func.func @transform_2(%arg0: i32) -> (i32, i32) {
    %c0_i32 = arith.constant 0 : i32
    %c0_i32_0 = arith.constant 0 : i32
    %c0_i32_1 = arith.constant 0 : i32
    return %c0_i32, %c0_i32_0 : i32, i32
  }
  func.func @transform_3(%arg0: i32) -> (i32, i32) {
    %c0_i32 = arith.constant 0 : i32
    %c0_i32_0 = arith.constant 0 : i32
    %c0_i32_1 = arith.constant 0 : i32
    return %c0_i32, %c0_i32_0 : i32, i32
  }
  func.func @transform_4(%arg0: i32) -> (i32, i32, i32, i32) {
    %c0_i32 = arith.constant 0 : i32
    %c0_i32_0 = arith.constant 0 : i32
    %c0_i32_1 = arith.constant 0 : i32
    %c0_i32_2 = arith.constant 0 : i32
    %c0_i32_3 = arith.constant 0 : i32
    return %c0_i32, %c0_i32_0, %c0_i32_1, %c0_i32_2 : i32, i32, i32, i32
  }
  func.func @transform_5(%arg0: i32) -> (i32, i32, i32, i32) {
    %c0_i32 = arith.constant 0 : i32
    %c0_i32_0 = arith.constant 0 : i32
    %c0_i32_1 = arith.constant 0 : i32
    %c0_i32_2 = arith.constant 0 : i32
    %c0_i32_3 = arith.constant 0 : i32
    return %c0_i32, %c0_i32_0, %c0_i32_1, %c0_i32_2 : i32, i32, i32, i32
  }
  func.func @transform_6(%arg0: i32) -> (i32, i32, i32, i32) {
    %c0_i32 = arith.constant 0 : i32
    %c0_i32_0 = arith.constant 0 : i32
    %c0_i32_1 = arith.constant 0 : i32
    %c0_i32_2 = arith.constant 0 : i32
    %c0_i32_3 = arith.constant 0 : i32
    return %c0_i32, %c0_i32_0, %c0_i32_1, %c0_i32_2 : i32, i32, i32, i32
  }
  func.func @transform_7(%arg0: i32) -> (i32, i32, i32, i32) {
    %c0_i32 = arith.constant 0 : i32
    %c0_i32_0 = arith.constant 0 : i32
    %c0_i32_1 = arith.constant 0 : i32
    %c0_i32_2 = arith.constant 0 : i32
    %c0_i32_3 = arith.constant 0 : i32
    return %c0_i32, %c0_i32_0, %c0_i32_1, %c0_i32_2 : i32, i32, i32, i32
  }
  func.func @transform_8(%arg0: i32) -> (i32, i32, i32, i32) {
    %c0_i32 = arith.constant 0 : i32
    %c0_i32_0 = arith.constant 0 : i32
    %c0_i32_1 = arith.constant 0 : i32
    %c0_i32_2 = arith.constant 0 : i32
    %c0_i32_3 = arith.constant 0 : i32
    return %c0_i32, %c0_i32_0, %c0_i32_1, %c0_i32_2 : i32, i32, i32, i32
  }
  func.func @transform_9(%arg0: i32) -> (i32, i32, i32, i32) {
    %c0_i32 = arith.constant 0 : i32
    %c0_i32_0 = arith.constant 0 : i32
    %c0_i32_1 = arith.constant 0 : i32
    %c0_i32_2 = arith.constant 0 : i32
    %c0_i32_3 = arith.constant 0 : i32
    return %c0_i32, %c0_i32_0, %c0_i32_1, %c0_i32_2 : i32, i32, i32, i32
  }
  func.func @transform_10(%arg0: i32) -> (i32, i32, i32, i32) {
    %c0_i32 = arith.constant 0 : i32
    %c0_i32_0 = arith.constant 0 : i32
    %c0_i32_1 = arith.constant 0 : i32
    %c0_i32_2 = arith.constant 0 : i32
    %c0_i32_3 = arith.constant 0 : i32
    return %c0_i32, %c0_i32_0, %c0_i32_1, %c0_i32_2 : i32, i32, i32, i32
  }
  func.func @transform_11(%arg0: i32) -> (i32, i32, i32) {
    %c0_i32 = arith.constant 0 : i32
    %c0_i32_0 = arith.constant 0 : i32
    %c0_i32_1 = arith.constant 0 : i32
    %c0_i32_2 = arith.constant 0 : i32
    return %c0_i32, %c0_i32_0, %c0_i32_1 : i32, i32, i32
  }
  func.func @transform_12(%arg0: i32) -> (i32, i32, i32) {
    %c0_i32 = arith.constant 0 : i32
    %c0_i32_0 = arith.constant 0 : i32
    %c0_i32_1 = arith.constant 0 : i32
    %c0_i32_2 = arith.constant 0 : i32
    return %c0_i32, %c0_i32_0, %c0_i32_1 : i32, i32, i32
  }
  func.func @transform_13(%arg0: i32) -> (i32, i32, i32) {
    %c0_i32 = arith.constant 0 : i32
    %c0_i32_0 = arith.constant 0 : i32
    %c0_i32_1 = arith.constant 0 : i32
    %c0_i32_2 = arith.constant 0 : i32
    return %c0_i32, %c0_i32_0, %c0_i32_1 : i32, i32, i32
  }
  func.func @transform_14(%arg0: i32) -> (i32, i32, i32) {
    %c0_i32 = arith.constant 0 : i32
    %c0_i32_0 = arith.constant 0 : i32
    %c0_i32_1 = arith.constant 0 : i32
    %c0_i32_2 = arith.constant 0 : i32
    return %c0_i32, %c0_i32_0, %c0_i32_1 : i32, i32, i32
  }
  func.func @transform_15(%arg0: i32) -> (i32, i32, i32) {
    %c0_i32 = arith.constant 0 : i32
    %c0_i32_0 = arith.constant 0 : i32
    %c0_i32_1 = arith.constant 0 : i32
    %c0_i32_2 = arith.constant 0 : i32
    return %c0_i32, %c0_i32_0, %c0_i32_1 : i32, i32, i32
  }
  func.func @transform_16(%arg0: i32) -> (i32, i32, i32) {
    %c0_i32 = arith.constant 0 : i32
    %c0_i32_0 = arith.constant 0 : i32
    %c0_i32_1 = arith.constant 0 : i32
    %c0_i32_2 = arith.constant 0 : i32
    return %c0_i32, %c0_i32_0, %c0_i32_1 : i32, i32, i32
  }
  func.func @transform_17(%arg0: i32) -> (i32, i32, i32) {
    %c0_i32 = arith.constant 0 : i32
    %c0_i32_0 = arith.constant 0 : i32
    %c0_i32_1 = arith.constant 0 : i32
    %c0_i32_2 = arith.constant 0 : i32
    return %c0_i32, %c0_i32_0, %c0_i32_1 : i32, i32, i32
  }
  func.func @transform_18(%arg0: i32) -> (i32, i32, i32) {
    %c0_i32 = arith.constant 0 : i32
    %c0_i32_0 = arith.constant 0 : i32
    %c0_i32_1 = arith.constant 0 : i32
    %c0_i32_2 = arith.constant 0 : i32
    return %c0_i32, %c0_i32_0, %c0_i32_1 : i32, i32, i32
  }
  func.func @transform_19(%arg0: i32) -> (i32, i32, i32) {
    %c0_i32 = arith.constant 0 : i32
    %c0_i32_0 = arith.constant 0 : i32
    %c0_i32_1 = arith.constant 0 : i32
    %c0_i32_2 = arith.constant 0 : i32
    return %c0_i32, %c0_i32_0, %c0_i32_1 : i32, i32, i32
  }
  func.func @transform_20(%arg0: i32) -> (i32, i32) {
    %c0_i32 = arith.constant 0 : i32
    %c0_i32_0 = arith.constant 0 : i32
    %c0_i32_1 = arith.constant 0 : i32
    return %c0_i32, %c0_i32_0 : i32, i32
  }
  func.func @transform_21(%arg0: i32) -> (i32, i32) {
    %c0_i32 = arith.constant 0 : i32
    %c0_i32_0 = arith.constant 0 : i32
    %c0_i32_1 = arith.constant 0 : i32
    return %c0_i32, %c0_i32_0 : i32, i32
  }
  func.func @transform_22(%arg0: i32) -> (i32, i32, i32) {
    %c0_i32 = arith.constant 0 : i32
    %c0_i32_0 = arith.constant 0 : i32
    %c0_i32_1 = arith.constant 0 : i32
    return %arg0, %c0_i32, %c0_i32_0 : i32, i32, i32
  }
}

</mosaic_0001>

<bundles_post_ra>
// kernel: decoder_forward.1
= control target key start
LH: loop header
LB: loop body
LE: loop exit
PB: predicated region body
PF: predicated region fallthrough
CT: control target
= control target key end

     0   :  { %s6154_s29 = smov 0   ;;  %s7082_s0 = inlined_call_operand.vmem [shape: f32[2,8,1], index: 0, kind: input, shape index: {}]   ;;  %s7083_s1 = inlined_call_operand.vmem [shape: f32[1,32], index: 1, kind: input, shape index: {}]   ;;  %s7084_s2 = inlined_call_operand.vmem [shape: f32[1,32], index: 2, kind: input, shape index: {}]   ;;  %s7085_s3 = inlined_call_operand.vmem [shape: f32[8,32], index: 3, kind: input, shape index: {}]   ;;  %s7086_s4 = inlined_call_operand.vmem [shape: f32[2,4,32,8], index: 4, kind: input, shape index: {}]   ;;  %s7087_s5 = inlined_call_operand.vmem [shape: f32[2,4,1,8], index: 5, kind: input, shape index: {}]   ;;  %s7088_s6 = inlined_call_operand.vmem [shape: f32[2,4,32,8], index: 6, kind: input, shape index: {}]   ;;  %s7089_s7 = inlined_call_operand.vmem [shape: f32[2,4,1,8], index: 7, kind: input, shape index: {}]   ;;  %s7090_s8 = inlined_call_operand.vmem [shape: f32[2,4,32,8], index: 8, kind: input, shape index: {}]   ;;  %s7091_s9 = inlined_call_operand.vmem [shape: f32[2,4,1,8], index: 9, kind: input, shape index: {}]   ;;  %s7092_s10 = inlined_call_operand.vmem [shape: f32[2,4,8,32], index: 10, kind: input, shape index: {}]   ;;  %s7093_s11 = inlined_call_operand.vmem [shape: f32[2,1,32], index: 11, kind: input, shape index: {}]   ;;  %s7094_s12 = inlined_call_operand.vmem [shape: f32[2,1,32], index: 12, kind: input, shape index: {}]   ;;  %s7095_s13 = inlined_call_operand.vmem [shape: f32[2,1,32], index: 13, kind: input, shape index: {}]   ;;  %s7096_s14 = inlined_call_operand.vmem [shape: f32[2,32,64], index: 14, kind: input, shape index: {}]   ;;  %s7097_s15 = inlined_call_operand.vmem [shape: f32[2,1,64], index: 15, kind: input, shape index: {}]   ;;  %s7098_s16 = inlined_call_operand.vmem [shape: f32[2,64,32], index: 16, kind: input, shape index: {}]   ;;  %s7099_s17 = inlined_call_operand.vmem [shape: f32[2,1,32], index: 17, kind: input, shape index: {}]   ;;  %s7100_s18 = inlined_call_operand.vmem [shape: f32[2,1,32], index: 18, kind: input, shape index: {}]   ;;  %s7101_s19 = inlined_call_operand.vmem [shape: f32[2,1,32], index: 19, kind: input, shape index: {}]   ;;  %s7102_s20 = inlined_call_operand.vmem [shape: f32[1,32], index: 20, kind: input, shape index: {}]   ;;  %s7103_s21 = inlined_call_operand.<no memory space> [shape: f32[1,1], index: 21, kind: input, shape index: {}]   ;;  %s7104_s22 = inlined_call_operand.vmem [shape: f32[2,8,1], index: 22, kind: output, shape index: {}]  }
   0x1   :  { %7108 = sst [smem:[#allocation3_spill]] %s7082_s0  ;;  %v27_v0 = vstv %s7103_s21 }
   0x2   :  { %7109 = sst [smem:[#allocation4_spill]] %s7083_s1  ;;  %28 = vst [vmem:[#allocation2] sm:$0x1] %v27_v0 }
   0x3   :  { %7110 = sst [smem:[#allocation5_spill]] %s7084_s2 }
   0x4   :  { %7111 = sst [smem:[#allocation6_spill]] %s7085_s3 }
   0x5   :  { %7112 = sst [smem:[#allocation7_spill]] %s7086_s4 }
   0x6   :  { %7113 = sst [smem:[#allocation8_spill]] %s7087_s5 }
   0x7   :  { %7114 = sst [smem:[#allocation9_spill]] %s7088_s6 }
   0x8 LB: > { %s5139_s30 = sadd.s32 4294967295, %s6031_s29   ;;  %p5143_p0 = scmp.ge.s32.totalorder %s6031_s29, 1  ;;  %s6031_s29 = sphi %s6154_s29, %s34_s29  }
   0x9   : > { %p613_p1 = scmp.lt.s32.totalorder %s6031_s29, 3 }
   0xb   : > { %p614_p2 = pnand %p5143_p0, %p613_p1 }
   0xc   : > { %p673_p3 = scmp.lt.s32.totalorder (!%p614_p2), %s5139_s30, 1  ;;  %s7115_s21 = sld [smem:[#allocation7_spill]] (!%p614_p2) }
   0xd   : > { %617 = sbr.rel (%p614_p2) target bundleno = 4589 (0x11ed), region = 108  ;;  %s7116_s23 = sld [smem:[#allocation3_spill]] (!%p614_p2) }
   0xe   : > { %s7117_s3 = sld [smem:[#allocation5_spill]] (!%p614_p2) }
   0xf   : > { %s7118_s0 = sld [smem:[#allocation6_spill]] (!%p614_p2) }
  0x10   : > { %s7119_s5 = sld [smem:[#allocation4_spill]] (!%p614_p2) }
  0x11   : > { %s7120_s28 = sld [smem:[#allocation9_spill]] (!%p614_p2) }
  0x12   : > { %v714_v1 = vld [vmem:[%s7115_s21 + $0x18] sm:$0xff]  ;;  %v6033_v3 = vmov 0   ;;  %v6034_v4 = vmov 0.0   ;;  %v713_v5 = vld [vmem:[%s7115_s21 + $0x10] sm:$0xff]  ;;  %s7123_s30 = smov (!%p673_p3, %s5139_s30), 1  ;;  %v712_v7 = vld [vmem:[%s7115_s21 + $0x8] sm:$0xff] }
  0x13   : > { %v718_v2 = vld [vmem:[%s7115_s21 + $0x38] sm:$0xff]  ;;  %5984 = vset.pattern.permute.xlu0 %v6033_v3  ;;  %5529 = vmatprep.subr.mxu0 %v6034_v4  ;;  %v717_v6 = vld [vmem:[%s7115_s21 + $0x30] sm:$0xff]  ;;  %s5144_s27 = sshll.u32 %s7123_s30, 3  ;;  %v716_v8 = vld [vmem:[%s7115_s21 + $0x28] sm:$0xff]  ;;  %vm6035_vm0 = vmmov 0   ;;  %vm800_vm1 = vcmask 261120  }
  0x14   : > { %5540 = vmatprep.subr.mxu1 %v6034_v4  ;;  %5530 = vmatpush3.msra.mxu0 %v714_v1  ;;  %s676_s1 = scalar_lea.vmem %s7116_s23, %s5144_s27  ;;  %v711_v10 = vld [vmem:[%s7115_s21] sm:$0xff]  ;;  %v722_v19 = vld [vmem:[%s7115_s21 + $0x58] sm:$0xff]  ;;  %v721_v21 = vld [vmem:[%s7115_s21 + $0x50] sm:$0xff]  ;;  %vm1692_vm2 = vcmask 64512   ;;  %s7121_s4 = sld [smem:[#allocation8_spill]]  ;;  %vm2778_vm4 = vcmask 523264  }
  0x15   : > { %5541 = vmatpush3.msra.mxu1 %v718_v2  ;;  %5531 = vmatprep.subr.mxu0 %v6034_v4  ;;  %v681_v9 = vld [vmem:[%s676_s1] sm:$0xff]  ;;  %v726_v20 = vld [vmem:[%s7115_s21 + $0x78] sm:$0xff]  ;;  %v725_v22 = vld [vmem:[%s7115_s21 + $0x70] sm:$0xff]  ;;  %s680_s25 = scalar_lea.vmem %s7104_s22, %s5144_s27  ;;  %vm5084_vm5 = vcmask 7168  }
  0x16   : > { %5542 = vmatprep.subr.mxu1 %v6034_v4  ;;  %5532 = vmatpush3.msra.mxu0 %v713_v5  ;;  %v715_v11 = vld [vmem:[%s7115_s21 + $0x20] sm:$0xff]  ;;  %v720_v23 = vld [vmem:[%s7115_s21 + $0x48] sm:$0xff]  ;;  %v754_v43 = vld [vmem:[%s7090_s8 + $0x18] sm:$0xff] }
  0x17   : > { %5543 = vmatpush3.msra.mxu1 %v717_v6  ;;  %5533 = vmatprep.subr.mxu0 %v6034_v4  ;;  %v5147_v12 = vld [vmem:[%s7117_s3] ss:$0 sm:$0xff]  ;;  %v724_v24 = vld [vmem:[%s7115_s21 + $0x68] sm:$0xff]  ;;  %v734_v27 = vld [vmem:[%s7120_s28 + $0x18] sm:$0xff] }
  0x18   : > { %5544 = vmatprep.subr.mxu1 %v6034_v4  ;;  %5534 = vmatpush3.msra.mxu0 %v712_v7  ;;  %v696_v13 = vld [vmem:[%s7118_s0] sm:$0xff]  ;;  %v738_v28 = vld [vmem:[%s7120_s28 + $0x38] sm:$0xff]  ;;  %v733_v29 = vld [vmem:[%s7120_s28 + $0x10] sm:$0xff] }
  0x19   : > { %685 = vperm.xlu0 %5984, %v681_v9   ;;  %5545 = vmatpush3.msra.mxu1 %v716_v8  ;;  %v5146_v14 = vld [vmem:[%s7119_s5] ss:$0 sm:$0xff]  ;;  %v703_v15 = vadd.f32 %v5147_v12, %v696_v13  ;;  %v737_v30 = vld [vmem:[%s7120_s28 + $0x30] sm:$0xff]  ;;  %v732_v31 = vld [vmem:[%s7120_s28 + $0x8] sm:$0xff] }
  0x1a   : > { %5535 = vmatprep.subr.mxu0 %v6034_v4  ;;  %5546 = vmatprep.subr.mxu1 %v6034_v4  ;;  %v719_v25 = vld [vmem:[%s7115_s21 + $0x40] sm:$0xff]  ;;  %v736_v32 = vld [vmem:[%s7120_s28 + $0x28] sm:$0xff]  ;;  %v742_v35 = vld [vmem:[%s7120_s28 + $0x58] sm:$0xff] }
  0x1b   : > { %5536 = vmatpush3.msra.mxu0 %v711_v10  ;;  %5547 = vmatpush3.msra.mxu1 %v715_v11  ;;  %v723_v26 = vld [vmem:[%s7115_s21 + $0x60] sm:$0xff]  ;;  %v746_v36 = vld [vmem:[%s7120_s28 + $0x78] sm:$0xff]  ;;  %v741_v37 = vld [vmem:[%s7120_s28 + $0x50] sm:$0xff] }
  0x1c   : > { %5537 = vmatprep.mubr.msk.f32.mxu0 %vm6035_vm0, %v6034_v4  ;;  %5548 = vmatprep.mubr.msk.f32.mxu1 %vm6035_vm0, %v6034_v4  ;;  %v731_v33 = vld [vmem:[%s7120_s28] sm:$0xff]  ;;  %v745_v38 = vld [vmem:[%s7120_s28 + $0x70] sm:$0xff]  ;;  %v740_v39 = vld [vmem:[%s7120_s28 + $0x48] sm:$0xff] }
  0x1d   : > { %5551 = vmatprep.subr.mxu0 %v6034_v4  ;;  %5562 = vmatprep.subr.mxu1 %v6034_v4  ;;  %v735_v34 = vld [vmem:[%s7120_s28 + $0x20] sm:$0xff]  ;;  %v744_v40 = vld [vmem:[%s7120_s28 + $0x68] sm:$0xff]  ;;  %v758_v44 = vld [vmem:[%s7090_s8 + $0x38] sm:$0xff] }
  0x1e   : > { %v739_v41 = vld [vmem:[%s7120_s28 + $0x40] sm:$0xff]  ;;  %v753_v45 = vld [vmem:[%s7090_s8 + $0x10] sm:$0xff]  ;;  %v752_v47 = vld [vmem:[%s7090_s8 + $0x8] sm:$0xff] }
  0x1f   : > { %v743_v42 = vld [vmem:[%s7120_s28 + $0x60] sm:$0xff]  ;;  %v757_v46 = vld [vmem:[%s7090_s8 + $0x30] sm:$0xff]  ;;  %v756_v48 = vld [vmem:[%s7090_s8 + $0x28] sm:$0xff] }
  0x20   : > { %v751_v49 = vld [vmem:[%s7090_s8] sm:$0xff]  ;;  %v762_v51 = vld [vmem:[%s7090_s8 + $0x58] sm:$0xff]  ;;  %v761_v53 = vld [vmem:[%s7090_s8 + $0x50] sm:$0xff] }
  0x21   : > { %v755_v50 = vld [vmem:[%s7090_s8 + $0x20] sm:$0xff]  ;;  %v766_v52 = vld [vmem:[%s7090_s8 + $0x78] sm:$0xff]  ;;  %v765_v54 = vld [vmem:[%s7090_s8 + $0x70] sm:$0xff] }
  0x22   : > { %v760_v55 = vld [vmem:[%s7090_s8 + $0x48] sm:$0xff]  ;;  %v759_v57 = vld [vmem:[%s7090_s8 + $0x40] sm:$0xff] }
  0x23   : > { %v764_v56 = vld [vmem:[%s7090_s8 + $0x68] sm:$0xff]  ;;  %v763_v58 = vld [vmem:[%s7090_s8 + $0x60] sm:$0xff] }
  0x24   : > { %v5156_v3 = vld [vmem:[%s7089_s7] ss:$0 sm:$0xff]  ;;  %v5157_v9 = vld [vmem:[%s7089_s7 + $0x1] ss:$0 sm:$0xff] }
  0x25   : > { %v5148_v7 = vld [vmem:[%s7121_s4] ss:$0 sm:$0xff]  ;;  %v5149_v13 = vld [vmem:[%s7121_s4 + $0x1] ss:$0 sm:$0xff] }
  0x94   : > { %v686_v16 = vpop.permute.xlu0 %685 }
  0x95   : > { %v694_v17 = vmul.f32 %v5146_v14, %v686_v16  ;;  %v5158_v16 = vld [vmem:[%s7089_s7 + $0x2] ss:$0 sm:$0xff] }
  0x97   : > { %v6217_v18 = vadd.f32 %v703_v15, %v694_v17  ;;  %v5159_v17 = vld [vmem:[%s7089_s7 + $0x3] ss:$0 sm:$0xff] }
  0x99   : > { %5538 = vmatmul.mubr.msk.f32.vlgmr.msra.gmra.mxu0 %vm800_vm1, %v6217_v18  ;;  %5549 = vmatmul.mubr.msk.f32.vlgmr.msra.gmra.mxu1 %vm800_vm1, %v6217_v18 }
  0x9a   : > { %5552 = vmatpush3.msra.mxu0 %v722_v19  ;;  %5563 = vmatpush3.msra.mxu1 %v726_v20 }
  0x9b   : > { %5553 = vmatprep.subr.mxu0 %v6034_v4  ;;  %5564 = vmatprep.subr.mxu1 %v6034_v4 }
  0x9c   : > { %5554 = vmatpush3.msra.mxu0 %v721_v21  ;;  %5565 = vmatpush3.msra.mxu1 %v725_v22  ;;  %v5150_v21 = vld [vmem:[%s7121_s4 + $0x2] ss:$0 sm:$0xff]  ;;  %v5151_v22 = vld [vmem:[%s7121_s4 + $0x3] ss:$0 sm:$0xff] }
  0x9d   : > { %5555 = vmatprep.subr.mxu0 %v6034_v4  ;;  %5566 = vmatprep.subr.mxu1 %v6034_v4 }
  0x9e   : > { %5556 = vmatpush3.msra.mxu0 %v720_v23  ;;  %5567 = vmatpush3.msra.mxu1 %v724_v24 }
  0x9f   : > { %5557 = vmatprep.subr.mxu0 %v6034_v4  ;;  %5568 = vmatprep.subr.mxu1 %v6034_v4 }
  0xa0   : > { %5558 = vmatpush3.msra.mxu0 %v719_v25  ;;  %5559 = vmatprep.mubr.msk.f32.mxu0 %vm6035_vm0, %v6034_v4 }
  0xa1   : > { %5569 = vmatpush3.msra.mxu1 %v723_v26  ;;  %5570 = vmatprep.mubr.msk.f32.mxu1 %vm6035_vm0, %v6034_v4 }
  0xa2   : > { %5560 = vmatmul.mubr.msk.f32.vlgmr.msra.gmra.mxu0 %vm800_vm1, %v6217_v18  ;;  %5571 = vmatmul.mubr.msk.f32.vlgmr.msra.gmra.mxu1 %vm800_vm1, %v6217_v18 }
  0xa3   : > { %5573 = vmatprep.subr.mxu0 %v6034_v4  ;;  %5584 = vmatprep.subr.mxu1 %v6034_v4 }
  0xa4   : > { %5574 = vmatpush3.msra.mxu0 %v734_v27  ;;  %5585 = vmatpush3.msra.mxu1 %v738_v28 }
  0xa5   : > { %5575 = vmatprep.subr.mxu0 %v6034_v4  ;;  %5586 = vmatprep.subr.mxu1 %v6034_v4 }
  0xa6   : > { %5576 = vmatpush3.msra.mxu0 %v733_v29  ;;  %5587 = vmatpush3.msra.mxu1 %v737_v30  ;;  %v5164_v29 = vld [vmem:[%s7091_s9] ss:$0 sm:$0xff]  ;;  %v5165_v30 = vld [vmem:[%s7091_s9 + $0x1] ss:$0 sm:$0xff] }
  0xa7   : > { %5577 = vmatprep.subr.mxu0 %v6034_v4  ;;  %5588 = vmatprep.subr.mxu1 %v6034_v4 }
  0xa8   : > { %5578 = vmatpush3.msra.mxu0 %v732_v31  ;;  %5589 = vmatpush3.msra.mxu1 %v736_v32 }
  0xa9   : > { %5579 = vmatprep.subr.mxu0 %v6034_v4  ;;  %5590 = vmatprep.subr.mxu1 %v6034_v4 }
  0xaa   : > { %5580 = vmatpush3.msra.mxu0 %v731_v33  ;;  %5581 = vmatprep.mubr.msk.f32.mxu0 %vm6035_vm0, %v6034_v4 }
  0xab   : > { %5591 = vmatpush3.msra.mxu1 %v735_v34  ;;  %5592 = vmatprep.mubr.msk.f32.mxu1 %vm6035_vm0, %v6034_v4 }
  0xac   : > { %5582 = vmatmul.mubr.msk.f32.vlgmr.msra.gmra.mxu0 %vm800_vm1, %v6217_v18  ;;  %5593 = vmatmul.mubr.msk.f32.vlgmr.msra.gmra.mxu1 %vm800_vm1, %v6217_v18 }
  0xad   : > { %5595 = vmatprep.subr.mxu0 %v6034_v4  ;;  %5606 = vmatprep.subr.mxu1 %v6034_v4 }
  0xae   : > { %5596 = vmatpush3.msra.mxu0 %v742_v35  ;;  %5607 = vmatpush3.msra.mxu1 %v746_v36 }
  0xaf   : > { %5597 = vmatprep.subr.mxu0 %v6034_v4  ;;  %5608 = vmatprep.subr.mxu1 %v6034_v4 }
  0xb0   : > { %5598 = vmatpush3.msra.mxu0 %v741_v37  ;;  %5609 = vmatpush3.msra.mxu1 %v745_v38 }
  0xb1   : > { %5599 = vmatprep.subr.mxu0 %v6034_v4  ;;  %5610 = vmatprep.subr.mxu1 %v6034_v4 }
  0xb2   : > { %5600 = vmatpush3.msra.mxu0 %v740_v39  ;;  %5611 = vmatpush3.msra.mxu1 %v744_v40 }
  0xb3   : > { %5601 = vmatprep.subr.mxu0 %v6034_v4  ;;  %5612 = vmatprep.subr.mxu1 %v6034_v4 }
  0xb4   : > { %5602 = vmatpush3.msra.mxu0 %v739_v41  ;;  %5603 = vmatprep.mubr.msk.f32.mxu0 %vm6035_vm0, %v6034_v4  ;;  %v705_v41 = vlaneseq }
  0xb5   : > { %5613 = vmatpush3.msra.mxu1 %v743_v42  ;;  %5614 = vmatprep.mubr.msk.f32.mxu1 %vm6035_vm0, %v6034_v4 }
  0xb6   : > { %5604 = vmatmul.mubr.msk.f32.vlgmr.msra.gmra.mxu0 %vm800_vm1, %v6217_v18  ;;  %5615 = vmatmul.mubr.msk.f32.vlgmr.msra.gmra.mxu1 %vm800_vm1, %v6217_v18  ;;  %v706_v42 = vshrl.u32 %v705_v41, 7 }
  0xb7   : > { %5617 = vmatprep.subr.mxu0 %v6034_v4  ;;  %5628 = vmatprep.subr.mxu1 %v6034_v4 }
  0xb8   : > { %5618 = vmatpush3.msra.mxu0 %v754_v43  ;;  %5629 = vmatpush3.msra.mxu1 %v758_v44  ;;  %v708_v43 = vand.u32 127, %v705_v41  ;;  %v773_v41 = vld [vmem:[%s7092_s10 + $0x10] sm:$0xff] }
  0xb9   : > { %5619 = vmatprep.subr.mxu0 %v6034_v4  ;;  %5630 = vmatprep.subr.mxu1 %v6034_v4 }
  0xba   : > { %5620 = vmatpush3.msra.mxu0 %v753_v45  ;;  %5631 = vmatpush3.msra.mxu1 %v757_v46  ;;  %vm709_vm3 = vcmp.gt.s32.totalorder %v708_v43, %v706_v42 }
  0xbb   : > { %5621 = vmatprep.subr.mxu0 %v6034_v4  ;;  %5632 = vmatprep.subr.mxu1 %v6034_v4  ;;  %v6484_v45 = vsel %vm709_vm3, -1e+09, %v6034_v4 }
  0xbc   : > { %5622 = vmatpush3.msra.mxu0 %v752_v47  ;;  %5633 = vmatpush3.msra.mxu1 %v756_v48 }
  0xbd   : > { %5623 = vmatprep.subr.mxu0 %v6034_v4  ;;  %5634 = vmatprep.subr.mxu1 %v6034_v4 }
  0xbe   : > { %5624 = vmatpush3.msra.mxu0 %v751_v49  ;;  %5625 = vmatprep.mubr.msk.f32.mxu0 %vm6035_vm0, %v6034_v4 }
  0xbf   : > { %5635 = vmatpush3.msra.mxu1 %v755_v50  ;;  %5636 = vmatprep.mubr.msk.f32.mxu1 %vm6035_vm0, %v6034_v4 }
  0xc0   : > { %5626 = vmatmul.mubr.msk.f32.vlgmr.msra.gmra.mxu0 %vm800_vm1, %v6217_v18  ;;  %5637 = vmatmul.mubr.msk.f32.vlgmr.msra.gmra.mxu1 %vm800_vm1, %v6217_v18 }
  0xc1   : > { %5639 = vmatprep.subr.mxu0 %v6034_v4  ;;  %5650 = vmatprep.subr.mxu1 %v6034_v4 }
  0xc2   : > { %5640 = vmatpush3.msra.mxu0 %v762_v51  ;;  %5651 = vmatpush3.msra.mxu1 %v766_v52 }
  0xc3   : > { %5641 = vmatprep.subr.mxu0 %v6034_v4  ;;  %5652 = vmatprep.subr.mxu1 %v6034_v4 }
  0xc4   : > { %5642 = vmatpush3.msra.mxu0 %v761_v53  ;;  %5653 = vmatpush3.msra.mxu1 %v765_v54 }
  0xc5   : > { %5643 = vmatprep.subr.mxu0 %v6034_v4  ;;  %5654 = vmatprep.subr.mxu1 %v6034_v4 }
  0xc6   : > { %5644 = vmatpush3.msra.mxu0 %v760_v55  ;;  %5655 = vmatpush3.msra.mxu1 %v764_v56 }
  0xc7   : > { %5645 = vmatprep.subr.mxu0 %v6034_v4  ;;  %5656 = vmatprep.subr.mxu1 %v6034_v4 }
  0xc8   : > { %5646 = vmatpush3.msra.mxu0 %v759_v57  ;;  %5647 = vmatprep.mubr.msk.f32.mxu0 %vm6035_vm0, %v6034_v4 }
  0xc9   : > { %5657 = vmatpush3.msra.mxu1 %v763_v58  ;;  %5658 = vmatprep.mubr.msk.f32.mxu1 %vm6035_vm0, %v6034_v4 }
  0xca   : > { %5648 = vmatmul.mubr.msk.f32.vlgmr.msra.gmra.mxu0 %vm800_vm1, %v6217_v18  ;;  %5659 = vmatmul.mubr.msk.f32.vlgmr.msra.gmra.mxu1 %vm800_vm1, %v6217_v18 }
  0xcb   : > { %5661 = vmatprep.subr.mxu0 %v6034_v4  ;;  %5663 = vmatprep.mubr.msk.f32.mxu0 %vm6035_vm0, %v6034_v4 }
  0xcc   : > { %5676 = vmatprep.subr.mxu1 %v6034_v4  ;;  %5678 = vmatprep.mubr.msk.f32.mxu1 %vm6035_vm0, %v6034_v4 }
 0x159   : > { %v870_v59 = vpop.f32.mrf.mxu0  ;;  %v940_v60 = vpop.f32.mrf.mxu1 }
 0x15a   : > { %v871_v12 = vadd.f32 %v5148_v7, %v870_v59  ;;  %v941_v15 = vadd.f32 %v5149_v13, %v940_v60 }
 0x15b   : > { %v5539_v61 = vpop.f32.mrf.mxu0  ;;  %v5550_v62 = vpop.f32.mrf.mxu1 }
 0x162   : > { %v1010_v63 = vpop.f32.mrf.mxu0  ;;  %v1080_v0 = vpop.f32.mrf.mxu1 }
 0x163   : > { %v1011_v27 = vadd.f32 %v5150_v21, %v1010_v63  ;;  %v1081_v28 = vadd.f32 %v5151_v22, %v1080_v0 }
 0x164   : > { %v5561_v1 = vpop.f32.mrf.mxu0  ;;  %v5572_v2 = vpop.f32.mrf.mxu1 }
 0x16c   : > { %v1174_v5 = vpop.f32.mrf.mxu0  ;;  %v1244_v6 = vpop.f32.mrf.mxu1 }
 0x16d   : > { %v1175_v8 = vadd.f32 %v5156_v3, %v1174_v5  ;;  %v1245_v14 = vadd.f32 %v5157_v9, %v1244_v6 }
 0x16e   : > { %v5583_v10 = vpop.f32.mrf.mxu0  ;;  %v5594_v11 = vpop.f32.mrf.mxu1 }
 0x16f   : > { %5662 = vmatpush3.xpose.msk.msra.mxu0 %vm1692_vm2, %v1175_v8 }
 0x170   : > { %5666 = vmatprep.subr.mxu0 %v6034_v4 }
 0x172   : > { %5664 = vmatmul.mubr.msk.f32.vlgmr.msra.gmra.mxu0 %vm1692_vm2, %v871_v12 }
 0x173   : > { %5667 = vmatpush3.xpose.msk.msra.mxu0 %vm1692_vm2, %v1245_v14  ;;  %5668 = vmatprep.mubr.msk.f32.mxu0 %vm6035_vm0, %v6034_v4 }
 0x174   : > { %5671 = vmatprep.subr.mxu0 %v6034_v4 }
 0x176   : > { %v1314_v19 = vpop.f32.mrf.mxu0  ;;  %v1384_v20 = vpop.f32.mrf.mxu1  ;;  %5669 = vmatmul.mubr.msk.f32.vlgmr.msra.gmra.mxu0 %vm1692_vm2, %v941_v15 }
 0x177   : > { %v1315_v23 = vadd.f32 %v5158_v16, %v1314_v19  ;;  %v1385_v24 = vadd.f32 %v5159_v17, %v1384_v20  ;;  %5673 = vmatprep.mubr.msk.f32.mxu0 %vm6035_vm0, %v6034_v4 }
 0x178   : > { %v5605_v25 = vpop.f32.mrf.mxu0  ;;  %v5616_v26 = vpop.f32.mrf.mxu1 }
 0x179   : > { %5672 = vmatpush3.xpose.msk.msra.mxu0 %vm1692_vm2, %v1315_v23  ;;  %5677 = vmatpush3.xpose.msk.msra.mxu1 %vm1692_vm2, %v1385_v24  ;;  %v5166_v26 = vld [vmem:[%s7091_s9 + $0x2] ss:$0 sm:$0xff] }
 0x17a   : > { %5681 = vmatprep.subr.mxu0 %v6034_v4  ;;  %5686 = vmatprep.subr.mxu1 %v6034_v4 }
 0x17c   : > { %5674 = vmatmul.mubr.msk.f32.vlgmr.msra.gmra.mxu0 %vm1692_vm2, %v1011_v27  ;;  %5679 = vmatmul.mubr.msk.f32.vlgmr.msra.gmra.mxu1 %vm1692_vm2, %v1081_v28 }
 0x17d   : > { %5683 = vmatprep.mubr.msk.f32.mxu0 %vm6035_vm0, %v6034_v4  ;;  %5688 = vmatprep.mubr.msk.f32.mxu1 %vm6035_vm0, %v6034_v4 }
 0x180   : > { %v1478_v31 = vpop.f32.mrf.mxu0  ;;  %v1548_v32 = vpop.f32.mrf.mxu1 }
 0x181   : > { %v1479_v33 = vadd.f32 %v5164_v29, %v1478_v31  ;;  %v1549_v34 = vadd.f32 %v5165_v30, %v1548_v32  ;;  %v5167_v31 = vld [vmem:[%s7091_s9 + $0x3] ss:$0 sm:$0xff] }
 0x182   : > { %v5627_v35 = vpop.f32.mrf.mxu0  ;;  %v5638_v36 = vpop.f32.mrf.mxu1 }
 0x183   : > { %5682 = vmatpush3.msra.mxu0 %v1479_v33  ;;  %5687 = vmatpush3.msra.mxu1 %v1549_v34 }
 0x184   : > { %5691 = vmatprep.subr.mxu0 %v6034_v4  ;;  %5696 = vmatprep.subr.mxu1 %v6034_v4 }
 0x18a   : > { %v6479_v37 = vpop.f32.mrf.mxu0  ;;  %v6481_v38 = vpop.f32.mrf.mxu1 }
 0x18b   : > { %v1619_v30 = vadd.f32 %v5166_v26, %v6479_v37  ;;  %v1689_v34 = vadd.f32 %v5167_v31, %v6481_v38  ;;  %v771_v38 = vld [vmem:[%s7092_s10] sm:$0xff]  ;;  %v2765_v31 = vld [vmem:[%s7098_s16 + $0x10] sm:$0xff] }
 0x18c   : > { %v5649_v39 = vpop.f32.mrf.mxu0  ;;  %v5660_v40 = vpop.f32.mrf.mxu1  ;;  %v5189_v26 = vld [vmem:[%s7094_s12] ss:$0 sm:$0xff] }
 0x18d   : > { %v772_v40 = vld [vmem:[%s7092_s10 + $0x8] sm:$0xff] }
 0x232   : > { %v1765_v44 = vpop.f32.mrf.mxu0 }
 0x233   : > { %v1997_v46 = vmul.f32 0.35355338, %v1765_v44  ;;  %v774_v44 = vld [vmem:[%s7092_s10 + $0x18] sm:$0xff] }
 0x234   : > { %v5665_v47 = vpop.f32.mrf.mxu0 }
 0x235   : > { %v2001_v48 = vadd.f32 %v1997_v46, %v6484_v45 }
 0x236   : > { %v1841_v49 = vpop.f32.mrf.mxu0 }
 0x237   : > { %v1998_v50 = vmul.f32 0.35355338, %v1841_v49  ;;  %v2005_v51 = vsel %vm1692_vm2, %v2001_v48, -inf }
 0x238   : > { %2006 = vmax.xlane.f32.xlu0 %v2005_v51  ;;  %v5670_v52 = vpop.f32.mrf.mxu0 }
 0x239   : > { %v2002_v53 = vadd.f32 %v1998_v50, %v6484_v45 }
 0x23b   : > { %v2008_v54 = vsel %vm1692_vm2, %v2002_v53, -inf }
 0x23c   : > { %v1917_v55 = vpop.f32.mrf.mxu0  ;;  %v1993_v56 = vpop.f32.mrf.mxu1  ;;  %2009 = vmax.xlane.f32.xlu1 %v2008_v54 }
 0x23d   : > { %v1999_v57 = vmul.f32 0.35355338, %v1917_v55  ;;  %v2000_v58 = vmul.f32 0.35355338, %v1993_v56 }
 0x23e   : > { %v5680_v59 = vpop.f32.mrf.mxu1  ;;  %v5675_v60 = vpop.f32.mrf.mxu0 }
 0x23f   : > { %v2003_v61 = vadd.f32 %v1999_v57, %v6484_v45  ;;  %v2004_v63 = vadd.f32 %v2000_v58, %v6484_v45 }
 0x241   : > { %v2011_v62 = vsel %vm1692_vm2, %v2003_v61, -inf  ;;  %v2014_v0 = vsel %vm1692_vm2, %v2004_v63, -inf }
 0x242   : > { %2012 = vmax.xlane.f32.xlu1 %v2011_v62 }
 0x246   : > { %2015 = vmax.xlane.f32.xlu1 %v2014_v0  ;;  %v5188_v0 = vld [vmem:[%s7093_s11] ss:$0 sm:$0xff] }
 0x2c1   : > { %v2007_v1 = vpop.xlane.xlu0 %2006 }
 0x2c2   : > { %v2017_v2 = vsub.f32 %v2001_v48, %v2007_v1 }
 0x2c4   : > { %v2021_v3 = vmul.f32 1.442695, %v2017_v2 }
 0x2c5   : > { %v2010_v5 = vpop.xlane.xlu1 %2009 }
 0x2c6   : > { %5985 = vpow2.f32 %v2021_v3  ;;  %v2018_v6 = vsub.f32 %v2002_v53, %v2010_v5 }
 0x2c8   : > { %v2023_v7 = vmul.f32 1.442695, %v2018_v6 }
 0x2ca   : > { %5987 = vpow2.f32 %v2023_v7 }
 0x2cb   : > { %v2013_v8 = vpop.xlane.xlu1 %2012 }
 0x2cc   : > { %v2019_v9 = vsub.f32 %v2003_v61, %v2013_v8 }
 0x2ce   : > { %v2025_v10 = vmul.f32 1.442695, %v2019_v9 }
 0x2cf   : > { %v2016_v11 = vpop.xlane.xlu1 %2015 }
 0x2d0   : > { %5989 = vpow2.f32 %v2025_v10  ;;  %v2020_v12 = vsub.f32 %v2004_v63, %v2016_v11 }
 0x2d2   : > { %v2027_v13 = vmul.f32 1.442695, %v2020_v12 }
 0x2d3   : > { %v5986_v14 = vpop.eup %5985 }
 0x2d4   : > { %5991 = vpow2.f32 %v2027_v13  ;;  %v2029_v15 = vsel %vm1692_vm2, %v5986_v14, 0.0  ;;  %v2681_v13 = vld [vmem:[%s7096_s14 + $0x18] sm:$0xff] }
 0x2d5   : > { %2030 = vadd.xlane.f32.xlu1 %v2029_v15  ;;  %v2678_v15 = vld [vmem:[%s7096_s14] sm:$0xff] }
 0x2d7   : > { %v5988_v16 = vpop.eup %5987 }
 0x2d8   : > { %v2032_v17 = vsel %vm1692_vm2, %v5988_v16, 0.0 }
 0x2d9   : > { %2033 = vadd.xlane.f32.xlu1 %v2032_v17  ;;  %v2769_v17 = vld [vmem:[%s7098_s16 + $0x30] sm:$0xff] }
 0x2dd   : > { %v5990_v19 = vpop.eup %5989 }
 0x2de   : > { %v2035_v20 = vsel %vm1692_vm2, %v5990_v19, 0.0 }
 0x2df   : > { %2036 = vadd.xlane.f32.xlu1 %v2035_v20  ;;  %v2767_v20 = vld [vmem:[%s7098_s16 + $0x20] sm:$0xff] }
 0x2e1   : > { %v5992_v21 = vpop.eup %5991 }
 0x2e2   : > { %v2038_v22 = vsel %vm1692_vm2, %v5992_v21, 0.0 }
 0x2e3   : > { %2039 = vadd.xlane.f32.xlu1 %v2038_v22 }
 0x35e   : > { %v2031_v23 = vpop.xlane.xlu1 %2030 }
 0x35f   : > { %5993 = vrcp.f32 %v2031_v23 }
 0x362   : > { %v2034_v24 = vpop.xlane.xlu1 %2033 }
 0x363   : > { %5995 = vrcp.f32 %v2034_v24 }
 0x368   : > { %v2037_v25 = vpop.xlane.xlu1 %2036 }
 0x369   : > { %5997 = vrcp.f32 %v2037_v25 }
 0x36c   : > { %v5994_v27 = vpop.eup %5993  ;;  %v2040_v28 = vpop.xlane.xlu1 %2039 }
 0x36d   : > { %5999 = vrcp.f32 %v2040_v28  ;;  %v2045_v29 = vmul.f32 %v5994_v27, %v5986_v14  ;;  %v2680_v14 = vld [vmem:[%s7096_s14 + $0x10] sm:$0xff]  ;;  %v5190_v28 = vld [vmem:[%s7095_s13] ss:$0 sm:$0xff] }
 0x36f   : > { %5684 = vmatmul.mubr.msk.f32.vlgmr.msra.gmra.mxu0 %vm1692_vm2, %v2045_v29 }
 0x370   : > { %v5996_v32 = vpop.eup %5995  ;;  %5692 = vmatpush3.msra.mxu0 %v1619_v30  ;;  %5693 = vmatprep.mubr.msk.f32.mxu0 %vm6035_vm0, %v6034_v4 }
 0x371   : > { %v2046_v33 = vmul.f32 %v5996_v32, %v5988_v16  ;;  %5701 = vmatprep.subr.mxu0 %v6034_v4  ;;  %v2770_v16 = vld [vmem:[%s7098_s16 + $0x38] sm:$0xff]  ;;  %v2764_v32 = vld [vmem:[%s7098_s16 + $0x8] sm:$0xff] }
 0x373   : > { %5689 = vmatmul.mubr.msk.f32.vlgmr.msra.gmra.mxu1 %vm1692_vm2, %v2046_v33  ;;  %v2763_v33 = vld [vmem:[%s7098_s16] sm:$0xff] }
 0x374   : > { %5697 = vmatpush3.msra.mxu1 %v1689_v34  ;;  %5698 = vmatprep.mubr.msk.f32.mxu1 %vm6035_vm0, %v6034_v4  ;;  %v5191_v34 = vld [vmem:[%s7097_s15] ss:$0 sm:$0xff] }
 0x375   : > { %5706 = vmatprep.subr.mxu1 %v6034_v4 }
 0x376   : > { %v5998_v35 = vpop.eup %5997 }
 0x377   : > { %v2047_v36 = vmul.f32 %v5998_v35, %v5990_v19  ;;  %v2768_v19 = vld [vmem:[%s7098_s16 + $0x28] sm:$0xff] }
 0x379   : > { %5694 = vmatmul.mubr.msk.f32.vlgmr.msra.gmra.mxu0 %vm1692_vm2, %v2047_v36 }
 0x37a   : > { %v6000_v37 = vpop.eup %5999  ;;  %5703 = vmatprep.mubr.msk.f32.mxu0 %vm6035_vm0, %v6034_v4  ;;  %5702 = vmatpush3.msra.mxu0 %v771_v38  ;;  %v5193_v38 = vld [vmem:[%s7099_s17] ss:$0 sm:$0xff] }
 0x37b   : > { %v2048_v39 = vmul.f32 %v6000_v37, %v5992_v21  ;;  %5711 = vmatprep.subr.mxu0 %v6034_v4  ;;  %v2766_v21 = vld [vmem:[%s7098_s16 + $0x18] sm:$0xff] }
 0x37d   : > { %5699 = vmatmul.mubr.msk.f32.vlgmr.msra.gmra.mxu1 %vm1692_vm2, %v2048_v39 }
 0x37e   : > { %5708 = vmatprep.mubr.msk.f32.mxu1 %vm6035_vm0, %v6034_v4  ;;  %5707 = vmatpush3.msra.mxu1 %v772_v40 }
 0x37f   : > { %5716 = vmatprep.subr.mxu1 %v6034_v4 }
 0x42f   : > { %v2118_v42 = vpop.f32.mrf.mxu0 }
 0x430   : > { %5704 = vmatmul.mubr.msk.f32.vlgmr.msra.gmra.mxu0 %vm1692_vm2, %v2118_v42 }
 0x431   : > { %v5685_v43 = vpop.f32.mrf.mxu0  ;;  %5712 = vmatpush3.msra.mxu0 %v773_v41  ;;  %5713 = vmatprep.mubr.msk.f32.mxu0 %vm6035_vm0, %v6034_v4 }
 0x432   : > { %5721 = vmatprep.subr.mxu0 %v6034_v4 }
 0x433   : > { %v2191_v46 = vpop.f32.mrf.mxu1 }
 0x434   : > { %5709 = vmatmul.mubr.msk.f32.vlgmr.msra.gmra.mxu1 %vm1692_vm2, %v2191_v46 }
 0x435   : > { %v5690_v47 = vpop.f32.mrf.mxu1  ;;  %5717 = vmatpush3.msra.mxu1 %v774_v44  ;;  %5718 = vmatprep.mubr.msk.f32.mxu1 %vm6035_vm0, %v6034_v4 }
 0x436   : > { %5732 = vmatprep.subr.mxu1 %v6034_v4 }
 0x439   : > { %v2264_v48 = vpop.f32.mrf.mxu0 }
 0x43a   : > { %5714 = vmatmul.mubr.msk.f32.vlgmr.msra.gmra.mxu0 %vm1692_vm2, %v2264_v48 }
 0x43b   : > { %v5695_v49 = vpop.f32.mrf.mxu0  ;;  %5729 = vmatprep.mubr.msk.f32.mxu0 %vm6035_vm0, %v6034_v4  ;;  %5722 = vmatpush3.msra.mxu0 %v2681_v13  ;;  %v5212_v13 = vld [vmem:[%s7115_s21 + $0xf8] sm:$0xff] }
 0x43c   : > { %5723 = vmatprep.subr.mxu0 %v6034_v4 }
 0x43d   : > { %v2337_v50 = vpop.f32.mrf.mxu1  ;;  %5724 = vmatpush3.msra.mxu0 %v2680_v14  ;;  %v5228_v14 = vld [vmem:[%s7120_s28 + $0xd8] sm:$0xff] }
 0x43e   : > { %5719 = vmatmul.mubr.msk.f32.vlgmr.msra.gmra.mxu1 %vm1692_vm2, %v2337_v50  ;;  %5725 = vmatprep.subr.mxu0 %v6034_v4 }
 0x43f   : > { %v5700_v51 = vpop.f32.mrf.mxu1  ;;  %5748 = vmatprep.mubr.msk.f32.mxu1 %vm6035_vm0, %v6034_v4  ;;  %5733 = vmatpush3.msra.mxu1 %v2770_v16  ;;  %v5210_v16 = vld [vmem:[%s7115_s21 + $0xe8] sm:$0xff] }
 0x440   : > { %5734 = vmatprep.subr.mxu1 %v6034_v4  ;;  %v5200_v51 = vld [vmem:[%s7115_s21 + $0x98] sm:$0xff] }
 0x441   : > { %5735 = vmatpush3.msra.mxu1 %v2769_v17  ;;  %v5226_v17 = vld [vmem:[%s7120_s28 + $0xc8] sm:$0xff] }
 0x442   : > { %5736 = vmatprep.subr.mxu1 %v6034_v4 }
 0x443   : > { %5737 = vmatpush3.msra.mxu1 %v2768_v19  ;;  %v5209_v19 = vld [vmem:[%s7115_s21 + $0xe0] sm:$0xff] }
 0x444   : > { %5738 = vmatprep.subr.mxu1 %v6034_v4 }
 0x445   : > { %5739 = vmatpush3.msra.mxu1 %v2767_v20  ;;  %v5225_v20 = vld [vmem:[%s7120_s28 + $0xc0] sm:$0xff] }
 0x446   : > { %5740 = vmatprep.subr.mxu1 %v6034_v4 }
 0x447   : > { %5741 = vmatpush3.msra.mxu1 %v2766_v21  ;;  %v5224_v21 = vld [vmem:[%s7120_s28 + $0xb8] sm:$0xff] }
 0x448   : > { %5742 = vmatprep.subr.mxu1 %v6034_v4 }
 0x449   : > { %5743 = vmatpush3.msra.mxu1 %v2765_v31  ;;  %v5231_v31 = vld [vmem:[%s7120_s28 + $0xf0] sm:$0xff] }
 0x44a   : > { %5744 = vmatprep.subr.mxu1 %v6034_v4 }
 0x44b   : > { %5745 = vmatpush3.msra.mxu1 %v2764_v32  ;;  %v5247_v32 = vld [vmem:[%s7090_s8 + $0xd0] sm:$0xff] }
 0x44c   : > { %5746 = vmatprep.subr.mxu1 %v6034_v4 }
 0x44d   : > { %5747 = vmatpush3.msra.mxu1 %v2763_v33  ;;  %v5230_v33 = vld [vmem:[%s7120_s28 + $0xe8] sm:$0xff] }
 0x44e   : > { %5773 = vmatprep.subr.mxu1 %v6034_v4 }
 0x4f0   : > { %v2410_v52 = vpop.f32.mrf.mxu0 }
 0x4f1   : > { %v2633_v58 = vsel %vm800_vm1, %v2410_v52, 0.0  ;;  %v5208_v52 = vld [vmem:[%s7115_s21 + $0xd8] sm:$0xff] }
 0x4f2   : > { %v5705_v53 = vpop.f32.mrf.mxu0 }
 0x4f3   : > { %v5199_v53 = vld [vmem:[%s7115_s21 + $0x90] sm:$0xff] }
 0x4f4   : > { %v2483_v54 = vpop.f32.mrf.mxu1 }
 0x4f5   : > { %v2634_v56 = vsel %vm800_vm1, %v2483_v54, 0.0  ;;  %v5207_v54 = vld [vmem:[%s7115_s21 + $0xd0] sm:$0xff] }
 0x4f6   : > { %v5710_v55 = vpop.f32.mrf.mxu1  ;;  %v2635_v60 = vadd.f32 %v2634_v56, %v2633_v58  ;;  %v5206_v56 = vld [vmem:[%s7115_s21 + $0xc8] sm:$0xff]  ;;  %v5205_v58 = vld [vmem:[%s7115_s21 + $0xc0] sm:$0xff] }
 0x4f7   : > { %v5198_v55 = vld [vmem:[%s7115_s21 + $0x88] sm:$0xff] }
 0x4fa   : > { %v2556_v57 = vpop.f32.mrf.mxu0 }
 0x4fb   : > { %v2636_v59 = vsel %vm800_vm1, %v2556_v57, 0.0  ;;  %v5197_v57 = vld [vmem:[%s7115_s21 + $0x80] sm:$0xff] }
 0x4fc   : > { %v5715_v61 = vpop.f32.mrf.mxu0  ;;  %v2637_v62 = vadd.f32 %v2636_v59, %v2635_v60 }
 0x4fe   : > { %v2629_v63 = vpop.f32.mrf.mxu1 }
 0x4ff   : > { %v2638_v1 = vsel %vm800_vm1, %v2629_v63, 0.0  ;;  %v5195_v63 = vld [vmem:[%s7100_s18] ss:$0 sm:$0xff] }
 0x500   : > { %v2639_v2 = vadd.f32 %v2638_v1, %v2637_v62  ;;  %v5720_v3 = vpop.f32.mrf.mxu1  ;;  %v5196_v1 = vld [vmem:[%s7101_s19] ss:$0 sm:$0xff] }
 0x502   : > { %v2646_v5 = vadd.f32 %v5188_v0, %v2639_v2 }
 0x504   : > { %v2647_v6 = vadd.f32 %v2646_v5, %v6217_v18  ;;  %v2679_v18 = vld [vmem:[%s7096_s14 + $0x8] sm:$0xff]  ;;  %v5204_v5 = vld [vmem:[%s7115_s21 + $0xb8] sm:$0xff] }
 0x505   : > { %5726 = vmatpush3.msra.mxu0 %v2679_v18  ;;  %v5211_v18 = vld [vmem:[%s7115_s21 + $0xf0] sm:$0xff] }
 0x506   : > { %v2650_v7 = vsel %vm800_vm1, %v2647_v6, 0.0  ;;  %5727 = vmatprep.subr.mxu0 %v6034_v4 }
 0x507   : > { %2651 = vadd.xlane.f32.xlu1 %v2650_v7  ;;  %5728 = vmatpush3.msra.mxu0 %v2678_v15  ;;  %v5203_v7 = vld [vmem:[%s7115_s21 + $0xb0] sm:$0xff] }
 0x508   : > { %5751 = vmatprep.subr.mxu0 %v6034_v4  ;;  %v5227_v15 = vld [vmem:[%s7120_s28 + $0xd0] sm:$0xff] }
 0x590   : > { %v2652_v8 = vpop.xlane.xlu1 %2651 }
 0x591   : > { %v2654_v9 = vmul.f32 0.03125, %v2652_v8  ;;  %v5219_v8 = vld [vmem:[%s7120_s28 + $0x90] sm:$0xff] }
 0x593   : > { %v2655_v10 = vsub.f32 %v2647_v6, %v2654_v9  ;;  %v5220_v6 = vld [vmem:[%s7120_s28 + $0x98] sm:$0xff]  ;;  %v5202_v9 = vld [vmem:[%s7115_s21 + $0xa8] sm:$0xff] }
 0x595   : > { %v2656_v11 = vmul.f32 %v2655_v10, %v2655_v10 }
 0x597   : > { %v2657_v12 = vsel %vm800_vm1, %v2656_v11, 0.0  ;;  %v5201_v11 = vld [vmem:[%s7115_s21 + $0xa0] sm:$0xff] }
 0x598   : > { %2658 = vadd.xlane.f32.xlu1 %v2657_v12  ;;  %v5217_v12 = vld [vmem:[%s7120_s28 + $0x80] sm:$0xff] }
 0x621   : > { %v2659_v22 = vpop.xlane.xlu1 %2658 }
 0x622   : > { %v2660_v23 = vmul.f32 0.03125, %v2659_v22  ;;  %v5240_v22 = vld [vmem:[%s7090_s8 + $0x98] sm:$0xff] }
 0x624   : > { %v2661_v24 = vadd.f32 1e-05, %v2660_v23  ;;  %v5223_v23 = vld [vmem:[%s7120_s28 + $0xb0] sm:$0xff] }
 0x626   : > { %6001 = vrsqrt.f32 %v2661_v24  ;;  %v5239_v24 = vld [vmem:[%s7090_s8 + $0x90] sm:$0xff] }
 0x633   : > { %v6002_v25 = vpop.eup %6001 }
 0x634   : > { %v2663_v27 = vmul.f32 %v6002_v25, %v2655_v10  ;;  %v5218_v10 = vld [vmem:[%s7120_s28 + $0x88] sm:$0xff] }
 0x635   : > { %v5222_v25 = vld [vmem:[%s7120_s28 + $0xa8] sm:$0xff] }
 0x636   : > { %v2670_v29 = vmul.f32 %v5189_v26, %v2663_v27  ;;  %v5238_v26 = vld [vmem:[%s7090_s8 + $0x88] sm:$0xff]  ;;  %v5221_v27 = vld [vmem:[%s7120_s28 + $0xa0] sm:$0xff] }
 0x638   : > { %v2677_v30 = vadd.f32 %v5190_v28, %v2670_v29  ;;  %v5237_v28 = vld [vmem:[%s7090_s8 + $0x80] sm:$0xff]  ;;  %v5232_v29 = vld [vmem:[%s7120_s28 + $0xf8] sm:$0xff] }
 0x63a   : > { %5730 = vmatmul.mubr.msk.f32.vlgmr.msra.gmra.mxu0 %vm800_vm1, %v2677_v30 }
 0x63b   : > { %5759 = vmatprep.mubr.msk.f32.mxu0 %vm6035_vm0, %v6034_v4  ;;  %5752 = vmatpush3.msra.mxu0 %v5200_v51 }
 0x63c   : > { %5753 = vmatprep.subr.mxu0 %v6034_v4 }
 0x63d   : > { %5754 = vmatpush3.msra.mxu0 %v5199_v53  ;;  %v5262_v53 = vld [vmem:[%s7121_s4 + $0x4] ss:$0 sm:$0xff] }
 0x63e   : > { %5755 = vmatprep.subr.mxu0 %v6034_v4 }
 0x63f   : > { %5756 = vmatpush3.msra.mxu0 %v5198_v55 }
 0x640   : > { %5757 = vmatprep.subr.mxu0 %v6034_v4 }
 0x641   : > { %5758 = vmatpush3.msra.mxu0 %v5197_v57 }
 0x642   : > { %5762 = vmatprep.subr.mxu0 %v6034_v4 }
 0x6fa   : > { %v2758_v35 = vpop.f32.mrf.mxu0 }
 0x6fb   : > { %v2759_v36 = vadd.f32 %v5191_v34, %v2758_v35  ;;  %v5246_v34 = vld [vmem:[%s7090_s8 + $0xc8] sm:$0xff]  ;;  %v5229_v35 = vld [vmem:[%s7120_s28 + $0xe0] sm:$0xff] }
 0x6fc   : > { %v5731_v37 = vpop.f32.mrf.mxu0 }
 0x6fd   : > { %v2762_v39 = vmax.f32 %v2759_v36, 0.0  ;;  %v5245_v36 = vld [vmem:[%s7090_s8 + $0xc0] sm:$0xff]  ;;  %v5244_v37 = vld [vmem:[%s7090_s8 + $0xb8] sm:$0xff] }
 0x6ff   : > { %5749 = vmatmul.mubr.msk.f32.vlgmr.msra.gmra.mxu1 %vm2778_vm4, %v2762_v39  ;;  %v5243_v39 = vld [vmem:[%s7090_s8 + $0xb0] sm:$0xff] }
 0x700   : > { %5781 = vmatprep.mubr.msk.f32.mxu1 %vm6035_vm0, %v6034_v4  ;;  %5774 = vmatpush3.msra.mxu1 %v5208_v52 }
 0x701   : > { %5775 = vmatprep.subr.mxu1 %v6034_v4 }
 0x702   : > { %5776 = vmatpush3.msra.mxu1 %v5207_v54 }
 0x703   : > { %5777 = vmatprep.subr.mxu1 %v6034_v4 }
 0x704   : > { %5778 = vmatpush3.msra.mxu1 %v5206_v56 }
 0x705   : > { %5779 = vmatprep.subr.mxu1 %v6034_v4 }
 0x706   : > { %5780 = vmatpush3.msra.mxu1 %v5205_v58  ;;  %v5272_v58 = vld [vmem:[%s7089_s7 + $0x6] ss:$0 sm:$0xff] }
 0x707   : > { %5795 = vmatprep.subr.mxu1 %v6034_v4 }
 0x7bf   : > { %v2848_v40 = vpop.f32.mrf.mxu1 }
 0x7c0   : > { %v2849_v41 = vadd.f32 %v5193_v38, %v2848_v40  ;;  %v5242_v38 = vld [vmem:[%s7090_s8 + $0xa8] sm:$0xff]  ;;  %v5241_v40 = vld [vmem:[%s7090_s8 + $0xa0] sm:$0xff] }
 0x7c1   : > { %v5750_v42 = vpop.f32.mrf.mxu1 }
 0x7c2   : > { %v2852_v43 = vadd.f32 %v2849_v41, %v2677_v30  ;;  %v5248_v30 = vld [vmem:[%s7090_s8 + $0xd8] sm:$0xff]  ;;  %v5251_v42 = vld [vmem:[%s7090_s8 + $0xf0] sm:$0xff] }
 0x7c3   : > { %v5252_v41 = vld [vmem:[%s7090_s8 + $0xf8] sm:$0xff] }
 0x7c4   : > { %v2855_v44 = vsel %vm800_vm1, %v2852_v43, 0.0 }
 0x7c5   : > { %2856 = vadd.xlane.f32.xlu0 %v2855_v44  ;;  %v5249_v44 = vld [vmem:[%s7090_s8 + $0xe0] sm:$0xff] }
 0x84e   : > { %v2857_v46 = vpop.xlane.xlu0 %2856 }
 0x84f   : > { %v2858_v47 = vmul.f32 0.03125, %v2857_v46 }
 0x851   : > { %v2859_v48 = vsub.f32 %v2852_v43, %v2858_v47  ;;  %v5250_v43 = vld [vmem:[%s7090_s8 + $0xe8] sm:$0xff] }
 0x853   : > { %v2860_v49 = vmul.f32 %v2859_v48, %v2859_v48 }
 0x855   : > { %v2861_v50 = vsel %vm800_vm1, %v2860_v49, 0.0 }
 0x856   : > { %2862 = vadd.xlane.f32.xlu1 %v2861_v50  ;;  %v5270_v50 = vld [vmem:[%s7089_s7 + $0x4] ss:$0 sm:$0xff] }
 0x8df   : > { %v2863_v59 = vpop.xlane.xlu1 %2862 }
 0x8e0   : > { %v2864_v60 = vmul.f32 0.03125, %v2863_v59 }
 0x8e2   : > { %v2865_v61 = vadd.f32 1e-05, %v2864_v60 }
 0x8e4   : > { %6003 = vrsqrt.f32 %v2865_v61  ;;  %v5264_v61 = vld [vmem:[%s7121_s4 + $0x6] ss:$0 sm:$0xff] }
 0x8f1   : > { %v6004_v62 = vpop.eup %6003 }
 0x8f2   : > { %v2867_v0 = vmul.f32 %v6004_v62, %v2859_v48 }
 0x8f4   : > { %v2874_v2 = vmul.f32 %v5195_v63, %v2867_v0 }
 0x8f6   : > { %v6664_v3 = vadd.f32 %v5196_v1, %v2874_v2  ;;  %v5271_v2 = vld [vmem:[%s7089_s7 + $0x5] ss:$0 sm:$0xff] }
 0x8f8   : > { %5760 = vmatmul.mubr.msk.f32.vlgmr.msra.gmra.mxu0 %vm800_vm1, %v6664_v3  ;;  %5782 = vmatmul.mubr.msk.f32.vlgmr.msra.gmra.mxu1 %vm800_vm1, %v6664_v3 }
 0x8f9   : > { %5763 = vmatpush3.msra.mxu0 %v5204_v5  ;;  %5796 = vmatpush3.msra.mxu1 %v5220_v6  ;;  %v5278_v5 = vld [vmem:[%s7091_s9 + $0x4] ss:$0 sm:$0xff] }
 0x8fa   : > { %5764 = vmatprep.subr.mxu0 %v6034_v4  ;;  %5797 = vmatprep.subr.mxu1 %v6034_v4 }
 0x8fb   : > { %5765 = vmatpush3.msra.mxu0 %v5203_v7  ;;  %5798 = vmatpush3.msra.mxu1 %v5219_v8  ;;  %v5263_v7 = vld [vmem:[%s7121_s4 + $0x5] ss:$0 sm:$0xff] }
 0x8fc   : > { %5766 = vmatprep.subr.mxu0 %v6034_v4  ;;  %5799 = vmatprep.subr.mxu1 %v6034_v4 }
 0x8fd   : > { %5767 = vmatpush3.msra.mxu0 %v5202_v9  ;;  %5800 = vmatpush3.msra.mxu1 %v5218_v10 }
 0x8fe   : > { %5768 = vmatprep.subr.mxu0 %v6034_v4  ;;  %5801 = vmatprep.subr.mxu1 %v6034_v4 }
 0x8ff   : > { %5769 = vmatpush3.msra.mxu0 %v5201_v11  ;;  %5770 = vmatprep.mubr.msk.f32.mxu0 %vm6035_vm0, %v6034_v4 }
 0x900   : > { %5802 = vmatpush3.msra.mxu1 %v5217_v12  ;;  %5803 = vmatprep.mubr.msk.f32.mxu1 %vm6035_vm0, %v6034_v4 }
 0x901   : > { %5771 = vmatmul.mubr.msk.f32.vlgmr.msra.gmra.mxu0 %vm800_vm1, %v6664_v3  ;;  %5784 = vmatprep.subr.mxu0 %v6034_v4 }
 0x902   : > { %5804 = vmatmul.mubr.msk.f32.vlgmr.msra.gmra.mxu1 %vm800_vm1, %v6664_v3  ;;  %5817 = vmatprep.subr.mxu1 %v6034_v4 }
 0x903   : > { %5785 = vmatpush3.msra.mxu0 %v5212_v13  ;;  %5818 = vmatpush3.msra.mxu1 %v5228_v14  ;;  %v5273_v14 = vld [vmem:[%s7089_s7 + $0x7] ss:$0 sm:$0xff] }
 0x904   : > { %5786 = vmatprep.subr.mxu0 %v6034_v4  ;;  %5819 = vmatprep.subr.mxu1 %v6034_v4 }
 0x905   : > { %5787 = vmatpush3.msra.mxu0 %v5211_v18  ;;  %5820 = vmatpush3.msra.mxu1 %v5227_v15  ;;  %v5265_v15 = vld [vmem:[%s7121_s4 + $0x7] ss:$0 sm:$0xff] }
 0x906   : > { %5788 = vmatprep.subr.mxu0 %v6034_v4  ;;  %5821 = vmatprep.subr.mxu1 %v6034_v4 }
 0x907   : > { %5789 = vmatpush3.msra.mxu0 %v5210_v16  ;;  %5822 = vmatpush3.msra.mxu1 %v5226_v17 }
 0x908   : > { %5790 = vmatprep.subr.mxu0 %v6034_v4  ;;  %5823 = vmatprep.subr.mxu1 %v6034_v4 }
 0x909   : > { %5791 = vmatpush3.msra.mxu0 %v5209_v19  ;;  %5792 = vmatprep.mubr.msk.f32.mxu0 %vm6035_vm0, %v6034_v4 }
 0x90a   : > { %5824 = vmatpush3.msra.mxu1 %v5225_v20  ;;  %5825 = vmatprep.mubr.msk.f32.mxu1 %vm6035_vm0, %v6034_v4 }
 0x90b   : > { %5793 = vmatmul.mubr.msk.f32.vlgmr.msra.gmra.mxu0 %vm800_vm1, %v6664_v3  ;;  %5806 = vmatprep.subr.mxu0 %v6034_v4 }
 0x90c   : > { %5826 = vmatmul.mubr.msk.f32.vlgmr.msra.gmra.mxu1 %vm800_vm1, %v6664_v3  ;;  %5839 = vmatprep.subr.mxu1 %v6034_v4 }
 0x90d   : > { %5807 = vmatpush3.msra.mxu0 %v5224_v21  ;;  %5840 = vmatpush3.msra.mxu1 %v5240_v22  ;;  %v5279_v22 = vld [vmem:[%s7091_s9 + $0x5] ss:$0 sm:$0xff] }
 0x90e   : > { %5808 = vmatprep.subr.mxu0 %v6034_v4  ;;  %5841 = vmatprep.subr.mxu1 %v6034_v4 }
 0x90f   : > { %5809 = vmatpush3.msra.mxu0 %v5223_v23  ;;  %5842 = vmatpush3.msra.mxu1 %v5239_v24 }
 0x910   : > { %5810 = vmatprep.subr.mxu0 %v6034_v4  ;;  %5843 = vmatprep.subr.mxu1 %v6034_v4 }
 0x911   : > { %5811 = vmatpush3.msra.mxu0 %v5222_v25  ;;  %5844 = vmatpush3.msra.mxu1 %v5238_v26 }
 0x912   : > { %5812 = vmatprep.subr.mxu0 %v6034_v4  ;;  %5845 = vmatprep.subr.mxu1 %v6034_v4 }
 0x913   : > { %5813 = vmatpush3.msra.mxu0 %v5221_v27  ;;  %5814 = vmatprep.mubr.msk.f32.mxu0 %vm6035_vm0, %v6034_v4 }
 0x914   : > { %5846 = vmatpush3.msra.mxu1 %v5237_v28  ;;  %5847 = vmatprep.mubr.msk.f32.mxu1 %vm6035_vm0, %v6034_v4 }
 0x915   : > { %5815 = vmatmul.mubr.msk.f32.vlgmr.msra.gmra.mxu0 %vm800_vm1, %v6664_v3  ;;  %5828 = vmatprep.subr.mxu0 %v6034_v4 }
 0x916   : > { %5848 = vmatmul.mubr.msk.f32.vlgmr.msra.gmra.mxu1 %vm800_vm1, %v6664_v3  ;;  %5861 = vmatprep.subr.mxu1 %v6034_v4 }
 0x917   : > { %5829 = vmatpush3.msra.mxu0 %v5232_v29  ;;  %5862 = vmatpush3.msra.mxu1 %v5248_v30 }
 0x918   : > { %5830 = vmatprep.subr.mxu0 %v6034_v4  ;;  %5863 = vmatprep.subr.mxu1 %v6034_v4 }
 0x919   : > { %5831 = vmatpush3.msra.mxu0 %v5231_v31  ;;  %5864 = vmatpush3.msra.mxu1 %v5247_v32 }
 0x91a   : > { %5832 = vmatprep.subr.mxu0 %v6034_v4  ;;  %5865 = vmatprep.subr.mxu1 %v6034_v4 }
 0x91b   : > { %5833 = vmatpush3.msra.mxu0 %v5230_v33  ;;  %5866 = vmatpush3.msra.mxu1 %v5246_v34 }
 0x91c   : > { %5834 = vmatprep.subr.mxu0 %v6034_v4  ;;  %5867 = vmatprep.subr.mxu1 %v6034_v4 }
 0x91d   : > { %5835 = vmatpush3.msra.mxu0 %v5229_v35  ;;  %5836 = vmatprep.mubr.msk.f32.mxu0 %vm6035_vm0, %v6034_v4 }
 0x91e   : > { %5868 = vmatpush3.msra.mxu1 %v5245_v36  ;;  %5869 = vmatprep.mubr.msk.f32.mxu1 %vm6035_vm0, %v6034_v4 }
 0x91f   : > { %5837 = vmatmul.mubr.msk.f32.vlgmr.msra.gmra.mxu0 %vm800_vm1, %v6664_v3  ;;  %5850 = vmatprep.subr.mxu0 %v6034_v4 }
 0x920   : > { %5870 = vmatmul.mubr.msk.f32.vlgmr.msra.gmra.mxu1 %vm800_vm1, %v6664_v3  ;;  %5851 = vmatpush3.msra.mxu0 %v5244_v37 }
 0x921   : > { %5852 = vmatprep.subr.mxu0 %v6034_v4  ;;  %5858 = vmatprep.mubr.msk.f32.mxu0 %vm6035_vm0, %v6034_v4 }
 0x922   : > { %5853 = vmatpush3.msra.mxu0 %v5243_v39  ;;  %5883 = vmatprep.subr.mxu1 %v6034_v4 }
 0x923   : > { %5854 = vmatprep.subr.mxu0 %v6034_v4  ;;  %5885 = vmatprep.mubr.msk.f32.mxu1 %vm6035_vm0, %v6034_v4 }
 0x924   : > { %5855 = vmatpush3.msra.mxu0 %v5242_v38 }
 0x925   : > { %5856 = vmatprep.subr.mxu0 %v6034_v4 }
 0x926   : > { %5857 = vmatpush3.msra.mxu0 %v5241_v40 }
 0x927   : > { %5859 = vmatmul.mubr.msk.f32.vlgmr.msra.gmra.mxu0 %vm800_vm1, %v6664_v3  ;;  %5872 = vmatprep.subr.mxu0 %v6034_v4 }
 0x928   : > { %5873 = vmatpush3.msra.mxu0 %v5252_v41  ;;  %5880 = vmatprep.mubr.msk.f32.mxu0 %vm6035_vm0, %v6034_v4 }
 0x929   : > { %5874 = vmatprep.subr.mxu0 %v6034_v4 }
 0x92a   : > { %5875 = vmatpush3.msra.mxu0 %v5251_v42 }
 0x92b   : > { %5876 = vmatprep.subr.mxu0 %v6034_v4 }
 0x92c   : > { %5877 = vmatpush3.msra.mxu0 %v5250_v43 }
 0x92d   : > { %5878 = vmatprep.subr.mxu0 %v6034_v4 }
 0x92e   : > { %5879 = vmatpush3.msra.mxu0 %v5249_v44 }
 0x92f   : > { %5881 = vmatmul.mubr.msk.f32.vlgmr.msra.gmra.mxu0 %vm800_vm1, %v6664_v3  ;;  %5893 = vmatprep.subr.mxu0 %v6034_v4 }
 0x930   : > { %5895 = vmatprep.mubr.msk.f32.mxu0 %vm6035_vm0, %v6034_v4 }
 0x9b8   : > { %v3048_v46 = vpop.f32.mrf.mxu0  ;;  %v3188_v47 = vpop.f32.mrf.mxu1 }
 0x9b9   : > { %v3049_v57 = vadd.f32 %v5262_v53, %v3048_v46  ;;  %v3189_v1 = vadd.f32 %v5264_v61, %v3188_v47 }
 0x9ba   : > { %v5761_v48 = vpop.f32.mrf.mxu0  ;;  %v5783_v49 = vpop.f32.mrf.mxu1 }
 0x9c1   : > { %v3118_v51 = vpop.f32.mrf.mxu0 }
 0x9c2   : > { %v3352_v52 = vpop.f32.mrf.mxu1  ;;  %v3119_v13 = vadd.f32 %v5263_v7, %v3118_v51 }
 0x9c3   : > { %v3353_v54 = vadd.f32 %v5270_v50, %v3352_v52  ;;  %v5772_v55 = vpop.f32.mrf.mxu0 }
 0x9c4   : > { %v5805_v56 = vpop.f32.mrf.mxu1 }
 0x9c5   : > { %5884 = vmatpush3.xpose.msk.msra.mxu1 %vm1692_vm2, %v3353_v54 }
 0x9c6   : > { %5888 = vmatprep.subr.mxu1 %v6034_v4 }
 0x9c8   : > { %5886 = vmatmul.mubr.msk.f32.vlgmr.msra.gmra.mxu1 %vm1692_vm2, %v3049_v57 }
 0x9c9   : > { %5890 = vmatprep.mubr.msk.f32.mxu1 %vm6035_vm0, %v6034_v4 }
 0x9cb   : > { %v3258_v59 = vpop.f32.mrf.mxu0 }
 0x9cc   : > { %v3492_v60 = vpop.f32.mrf.mxu1  ;;  %v3259_v21 = vadd.f32 %v5265_v15, %v3258_v59  ;;  %v5281_v15 = vld [vmem:[%s7091_s9 + $0x7] ss:$0 sm:$0xff] }
 0x9cd   : > { %v3493_v62 = vadd.f32 %v5272_v58, %v3492_v60  ;;  %v5794_v63 = vpop.f32.mrf.mxu0 }
 0x9ce   : > { %v5827_v0 = vpop.f32.mrf.mxu1 }
 0x9cf   : > { %5894 = vmatpush3.xpose.msk.msra.mxu0 %vm1692_vm2, %v3493_v62 }
 0x9d0   : > { %5903 = vmatprep.subr.mxu0 %v6034_v4 }
 0x9d2   : > { %5896 = vmatmul.mubr.msk.f32.vlgmr.msra.gmra.mxu0 %vm1692_vm2, %v3189_v1 }
 0x9d3   : > { %5905 = vmatprep.mubr.msk.f32.mxu0 %vm6035_vm0, %v6034_v4 }
 0x9d5   : > { %v3422_v6 = vpop.f32.mrf.mxu0 }
 0x9d6   : > { %v3423_v8 = vadd.f32 %v5271_v2, %v3422_v6  ;;  %v3656_v9 = vpop.f32.mrf.mxu1 }
 0x9d7   : > { %v3657_v10 = vadd.f32 %v5278_v5, %v3656_v9  ;;  %v5816_v11 = vpop.f32.mrf.mxu0 }
 0x9d8   : > { %v5849_v12 = vpop.f32.mrf.mxu1  ;;  %5889 = vmatpush3.xpose.msk.msra.mxu1 %vm1692_vm2, %v3423_v8  ;;  %v5280_v8 = vld [vmem:[%s7091_s9 + $0x6] ss:$0 sm:$0xff] }
 0x9d9   : > { %5904 = vmatpush3.msra.mxu0 %v3657_v10  ;;  %5898 = vmatprep.subr.mxu1 %v6034_v4 }
 0x9da   : > { %5913 = vmatprep.subr.mxu0 %v6034_v4 }
 0x9db   : > { %5891 = vmatmul.mubr.msk.f32.vlgmr.msra.gmra.mxu1 %vm1692_vm2, %v3119_v13 }
 0x9dc   : > { %5900 = vmatprep.mubr.msk.f32.mxu1 %vm6035_vm0, %v6034_v4 }
 0x9df   : > { %v3562_v18 = vpop.f32.mrf.mxu0 }
 0x9e0   : > { %v3563_v16 = vadd.f32 %v5273_v14, %v3562_v18  ;;  %v6917_v17 = vpop.f32.mrf.mxu1 }
 0x9e1   : > { %v5838_v19 = vpop.f32.mrf.mxu0  ;;  %v3797_v11 = vadd.f32 %v5280_v8, %v6917_v17  ;;  %v5305_v8 = vld [vmem:[%s7094_s12 + $0x1] ss:$0 sm:$0xff] }
 0x9e2   : > { %v5871_v20 = vpop.f32.mrf.mxu1  ;;  %5899 = vmatpush3.xpose.msk.msra.mxu1 %vm1692_vm2, %v3563_v16 }
 0x9e3   : > { %5908 = vmatprep.subr.mxu1 %v6034_v4 }
 0x9e5   : > { %5901 = vmatmul.mubr.msk.f32.vlgmr.msra.gmra.mxu1 %vm1692_vm2, %v3259_v21 }
 0x9e6   : > { %5910 = vmatprep.mubr.msk.f32.mxu1 %vm6035_vm0, %v6034_v4 }
 0x9e7   : > { %v3726_v23 = vpop.f32.mrf.mxu0 }
 0x9e8   : > { %v3727_v24 = vadd.f32 %v5279_v22, %v3726_v23  ;;  %v5257_v22 = vld [vmem:[%s7092_s10 + $0x20] sm:$0xff]  ;;  %v5258_v23 = vld [vmem:[%s7092_s10 + $0x28] sm:$0xff] }
 0x9e9   : > { %v5860_v25 = vpop.f32.mrf.mxu0 }
 0x9ea   : > { %5909 = vmatpush3.msra.mxu1 %v3727_v24  ;;  %v5259_v24 = vld [vmem:[%s7092_s10 + $0x30] sm:$0xff] }
 0x9eb   : > { %5918 = vmatprep.subr.mxu1 %v6034_v4 }
 0x9ef   : > { %v6928_v26 = vpop.f32.mrf.mxu0 }
 0x9f0   : > { %v3867_v19 = vadd.f32 %v5281_v15, %v6928_v26  ;;  %v5312_v15 = vld [vmem:[%s7097_s15 + $0x1] ss:$0 sm:$0xff] }
 0x9f1   : > { %v5882_v27 = vpop.f32.mrf.mxu0 }
 0xa88   : > { %v3942_v28 = vpop.f32.mrf.mxu1 }
 0xa89   : > { %v4174_v29 = vmul.f32 0.35355338, %v3942_v28 }
 0xa8a   : > { %v5887_v30 = vpop.f32.mrf.mxu1 }
 0xa8b   : > { %v4178_v31 = vadd.f32 %v4174_v29, %v6484_v45  ;;  %v5260_v29 = vld [vmem:[%s7092_s10 + $0x38] sm:$0xff] }
 0xa8d   : > { %v4182_v32 = vsel %vm1692_vm2, %v4178_v31, -inf }
 0xa8e   : > { %4183 = vmax.xlane.f32.xlu0 %v4182_v32 }
 0xa92   : > { %v4094_v33 = vpop.f32.mrf.mxu0 }
 0xa93   : > { %v4176_v34 = vmul.f32 0.35355338, %v4094_v33 }
 0xa94   : > { %v5897_v35 = vpop.f32.mrf.mxu0 }
 0xa95   : > { %v4180_v36 = vadd.f32 %v4176_v34, %v6484_v45 }
 0xa97   : > { %v4188_v37 = vsel %vm1692_vm2, %v4180_v36, -inf }
 0xa98   : > { %4189 = vmax.xlane.f32.xlu0 %v4188_v37 }
 0xa9b   : > { %v4018_v39 = vpop.f32.mrf.mxu1 }
 0xa9c   : > { %v4175_v38 = vmul.f32 0.35355338, %v4018_v39 }
 0xa9d   : > { %v5892_v40 = vpop.f32.mrf.mxu1 }
 0xa9e   : > { %v4179_v41 = vadd.f32 %v4175_v38, %v6484_v45 }
 0xaa0   : > { %v4185_v42 = vsel %vm1692_vm2, %v4179_v41, -inf }
 0xaa1   : > { %4186 = vmax.xlane.f32.xlu1 %v4185_v42 }
 0xaa5   : > { %v4170_v43 = vpop.f32.mrf.mxu1 }
 0xaa6   : > { %v4177_v44 = vmul.f32 0.35355338, %v4170_v43 }
 0xaa7   : > { %v5902_v46 = vpop.f32.mrf.mxu1 }
 0xaa8   : > { %v4181_v47 = vadd.f32 %v4177_v44, %v6484_v45 }
 0xaaa   : > { %v4191_v48 = vsel %vm1692_vm2, %v4181_v47, -inf }
 0xaab   : > { %4192 = vmax.xlane.f32.xlu1 %v4191_v48 }
 0xb17   : > { %v4184_v49 = vpop.xlane.xlu0 %4183 }
 0xb18   : > { %v4194_v50 = vsub.f32 %v4178_v31, %v4184_v49 }
 0xb1a   : > { %v4198_v51 = vmul.f32 1.442695, %v4194_v50 }
 0xb1c   : > { %6005 = vpow2.f32 %v4198_v51 }
 0xb21   : > { %v4190_v52 = vpop.xlane.xlu0 %4189 }
 0xb22   : > { %v4196_v53 = vsub.f32 %v4180_v36, %v4190_v52 }
 0xb24   : > { %v4202_v54 = vmul.f32 1.442695, %v4196_v53 }
 0xb26   : > { %6007 = vpow2.f32 %v4202_v54 }
 0xb29   : > { %v6006_v55 = vpop.eup %6005 }
 0xb2a   : > { %v4187_v56 = vpop.xlane.xlu1 %4186  ;;  %v4206_v57 = vsel %vm1692_vm2, %v6006_v55, 0.0 }
 0xb2b   : > { %v4195_v58 = vsub.f32 %v4179_v41, %v4187_v56  ;;  %4207 = vadd.xlane.f32.xlu0 %v4206_v57 }
 0xb2d   : > { %v4200_v59 = vmul.f32 1.442695, %v4195_v58 }
 0xb2f   : > { %6009 = vpow2.f32 %v4200_v59  ;;  %v5310_v59 = vld [vmem:[%s7096_s14 + $0x38] sm:$0xff] }
 0xb33   : > { %v6008_v45 = vpop.eup %6007 }
 0xb34   : > { %v4193_v60 = vpop.xlane.xlu1 %4192  ;;  %v4212_v61 = vsel %vm1692_vm2, %v6008_v45, 0.0 }
 0xb35   : > { %v4197_v62 = vsub.f32 %v4181_v47, %v4193_v60  ;;  %4213 = vadd.xlane.f32.xlu0 %v4212_v61  ;;  %v5302_v47 = vld [vmem:[%s7093_s11 + $0x1] ss:$0 sm:$0xff]  ;;  %v5321_v61 = vld [vmem:[%s7098_s16 + $0x78] sm:$0xff] }
 0xb36   : > { %v5307_v60 = vld [vmem:[%s7096_s14 + $0x20] sm:$0xff] }
 0xb37   : > { %v4204_v63 = vmul.f32 1.442695, %v4197_v62  ;;  %v5320_v62 = vld [vmem:[%s7098_s16 + $0x70] sm:$0xff] }
 0xb39   : > { %6011 = vpow2.f32 %v4204_v63  ;;  %v5319_v63 = vld [vmem:[%s7098_s16 + $0x68] sm:$0xff] }
 0xb3c   : > { %v6010_v0 = vpop.eup %6009 }
 0xb3d   : > { %v4209_v1 = vsel %vm1692_vm2, %v6010_v0, 0.0 }
 0xb3e   : > { %4210 = vadd.xlane.f32.xlu1 %v4209_v1  ;;  %v5317_v1 = vld [vmem:[%s7098_s16 + $0x58] sm:$0xff] }
 0xb46   : > { %v6012_v2 = vpop.eup %6011 }
 0xb47   : > { %v4215_v5 = vsel %vm1692_vm2, %v6012_v2, 0.0 }
 0xb48   : > { %4216 = vadd.xlane.f32.xlu1 %v4215_v5 }
 0xbb4   : > { %v4208_v6 = vpop.xlane.xlu0 %4207 }
 0xbb5   : > { %6013 = vrcp.f32 %v4208_v6 }
 0xbbe   : > { %v4214_v7 = vpop.xlane.xlu0 %4213 }
 0xbbf   : > { %6015 = vrcp.f32 %v4214_v7 }
 0xbc2   : > { %v6014_v9 = vpop.eup %6013 }
 0xbc3   : > { %v4222_v10 = vmul.f32 %v6014_v9, %v6006_v55 }
 0xbc5   : > { %5906 = vmatmul.mubr.msk.f32.vlgmr.msra.gmra.mxu0 %vm1692_vm2, %v4222_v10  ;;  %v5306_v10 = vld [vmem:[%s7095_s13 + $0x1] ss:$0 sm:$0xff] }
 0xbc6   : > { %5914 = vmatpush3.msra.mxu0 %v3797_v11  ;;  %5915 = vmatprep.mubr.msk.f32.mxu0 %vm6035_vm0, %v6034_v4 }
 0xbc7   : > { %v4211_v12 = vpop.xlane.xlu1 %4210  ;;  %5923 = vmatprep.subr.mxu0 %v6034_v4 }
 0xbc8   : > { %6017 = vrcp.f32 %v4211_v12 }
 0xbcc   : > { %v6016_v13 = vpop.eup %6015 }
 0xbcd   : > { %v4224_v14 = vmul.f32 %v6016_v13, %v6008_v45  ;;  %v5309_v45 = vld [vmem:[%s7096_s14 + $0x30] sm:$0xff] }
 0xbce   : > { %v5316_v13 = vld [vmem:[%s7098_s16 + $0x50] sm:$0xff] }
 0xbcf   : > { %5916 = vmatmul.mubr.msk.f32.vlgmr.msra.gmra.mxu0 %vm1692_vm2, %v4224_v14  ;;  %v5315_v14 = vld [vmem:[%s7098_s16 + $0x48] sm:$0xff] }
 0xbd0   : > { %5925 = vmatprep.mubr.msk.f32.mxu0 %vm6035_vm0, %v6034_v4  ;;  %5924 = vmatpush3.msra.mxu0 %v5257_v22 }
 0xbd1   : > { %v4217_v18 = vpop.xlane.xlu1 %4216  ;;  %5933 = vmatprep.subr.mxu0 %v6034_v4 }
 0xbd2   : > { %6019 = vrcp.f32 %v4217_v18  ;;  %v5314_v18 = vld [vmem:[%s7098_s16 + $0x40] sm:$0xff] }
 0xbd5   : > { %v6018_v16 = vpop.eup %6017 }
 0xbd6   : > { %v4223_v17 = vmul.f32 %v6018_v16, %v6010_v0  ;;  %v5318_v0 = vld [vmem:[%s7098_s16 + $0x60] sm:$0xff] }
 0xbd8   : > { %5911 = vmatmul.mubr.msk.f32.vlgmr.msra.gmra.mxu1 %vm1692_vm2, %v4223_v17 }
 0xbd9   : > { %5919 = vmatpush3.msra.mxu1 %v3867_v19  ;;  %5920 = vmatprep.mubr.msk.f32.mxu1 %vm6035_vm0, %v6034_v4 }
 0xbda   : > { %5928 = vmatprep.subr.mxu1 %v6034_v4 }
 0xbdf   : > { %v6020_v20 = vpop.eup %6019 }
 0xbe0   : > { %v4225_v21 = vmul.f32 %v6020_v20, %v6012_v2 }
 0xbe2   : > { %5921 = vmatmul.mubr.msk.f32.vlgmr.msra.gmra.mxu1 %vm1692_vm2, %v4225_v21  ;;  %v5323_v21 = vld [vmem:[%s7099_s17 + $0x1] ss:$0 sm:$0xff] }
 0xbe3   : > { %5930 = vmatprep.mubr.msk.f32.mxu1 %vm6035_vm0, %v6034_v4  ;;  %5929 = vmatpush3.msra.mxu1 %v5258_v23 }
 0xbe4   : > { %5938 = vmatprep.subr.mxu1 %v6034_v4 }
 0xc85   : > { %v4295_v25 = vpop.f32.mrf.mxu0 }
 0xc86   : > { %5926 = vmatmul.mubr.msk.f32.vlgmr.msra.gmra.mxu0 %vm1692_vm2, %v4295_v25 }
 0xc87   : > { %v5907_v26 = vpop.f32.mrf.mxu0  ;;  %5934 = vmatpush3.msra.mxu0 %v5259_v24  ;;  %5935 = vmatprep.mubr.msk.f32.mxu0 %vm6035_vm0, %v6034_v4 }
 0xc88   : > { %5943 = vmatprep.subr.mxu0 %v6034_v4 }
 0xc8f   : > { %v4441_v27 = vpop.f32.mrf.mxu0 }
 0xc90   : > { %5936 = vmatmul.mubr.msk.f32.vlgmr.msra.gmra.mxu0 %vm1692_vm2, %v4441_v27 }
 0xc91   : > { %v5917_v28 = vpop.f32.mrf.mxu0  ;;  %5951 = vmatprep.mubr.msk.f32.mxu0 %vm6035_vm0, %v6034_v4  ;;  %5944 = vmatpush3.msra.mxu0 %v5310_v59 }
 0xc92   : > { %5945 = vmatprep.subr.mxu0 %v6034_v4 }
 0xc93   : > { %5946 = vmatpush3.msra.mxu0 %v5309_v45 }
 0xc94   : > { %5947 = vmatprep.subr.mxu0 %v6034_v4 }
 0xc98   : > { %v4368_v30 = vpop.f32.mrf.mxu1 }
 0xc99   : > { %5931 = vmatmul.mubr.msk.f32.vlgmr.msra.gmra.mxu1 %vm1692_vm2, %v4368_v30 }
 0xc9a   : > { %v5912_v31 = vpop.f32.mrf.mxu1  ;;  %5939 = vmatpush3.msra.mxu1 %v5260_v29  ;;  %5940 = vmatprep.mubr.msk.f32.mxu1 %vm6035_vm0, %v6034_v4 }
 0xc9b   : > { %5954 = vmatprep.subr.mxu1 %v6034_v4 }
 0xca2   : > { %v4514_v32 = vpop.f32.mrf.mxu1 }
 0xca3   : > { %5941 = vmatmul.mubr.msk.f32.vlgmr.msra.gmra.mxu1 %vm1692_vm2, %v4514_v32 }
 0xca4   : > { %v5922_v33 = vpop.f32.mrf.mxu1  ;;  %5970 = vmatprep.mubr.msk.f32.mxu1 %vm6035_vm0, %v6034_v4  ;;  %5955 = vmatpush3.msra.mxu1 %v5321_v61 }
 0xca5   : > { %5956 = vmatprep.subr.mxu1 %v6034_v4 }
 0xca6   : > { %5957 = vmatpush3.msra.mxu1 %v5320_v62 }
 0xca7   : > { %5958 = vmatprep.subr.mxu1 %v6034_v4 }
 0xca8   : > { %5959 = vmatpush3.msra.mxu1 %v5319_v63 }
 0xca9   : > { %5960 = vmatprep.subr.mxu1 %v6034_v4 }
 0xcaa   : > { %5961 = vmatpush3.msra.mxu1 %v5318_v0 }
 0xcab   : > { %5962 = vmatprep.subr.mxu1 %v6034_v4 }
 0xcac   : > { %5963 = vmatpush3.msra.mxu1 %v5317_v1 }
 0xcad   : > { %5964 = vmatprep.subr.mxu1 %v6034_v4 }
 0xcae   : > { %5965 = vmatpush3.msra.mxu1 %v5316_v13 }
 0xcaf   : > { %5966 = vmatprep.subr.mxu1 %v6034_v4 }
 0xcb0   : > { %5967 = vmatpush3.msra.mxu1 %v5315_v14 }
 0xcb1   : > { %5968 = vmatprep.subr.mxu1 %v6034_v4 }
 0xcb2   : > { %5969 = vmatpush3.msra.mxu1 %v5314_v18 }
 0xd46   : > { %v4587_v34 = vpop.f32.mrf.mxu0 }
 0xd47   : > { %v4810_v41 = vsel %vm800_vm1, %v4587_v34, 0.0 }
 0xd48   : > { %v5927_v35 = vpop.f32.mrf.mxu0 }
 0xd49   : > { %v5327_v35 = vld [vmem:[%s7100_s18 + $0x1] ss:$0 sm:$0xff] }
 0xd50   : > { %v4733_v36 = vpop.f32.mrf.mxu0 }
 0xd51   : > { %v4813_v43 = vsel %vm800_vm1, %v4733_v36, 0.0 }
 0xd52   : > { %v5937_v37 = vpop.f32.mrf.mxu0 }
 0xd53   : > { %v5328_v37 = vld [vmem:[%s7101_s19 + $0x1] ss:$0 sm:$0xff] }
 0xd59   : > { %v4660_v39 = vpop.f32.mrf.mxu1 }
 0xd5a   : > { %v4811_v40 = vsel %vm800_vm1, %v4660_v39, 0.0 }
 0xd5b   : > { %v5932_v38 = vpop.f32.mrf.mxu1  ;;  %v4812_v42 = vadd.f32 %v4811_v40, %v4810_v41 }
 0xd5c   : > { %v5329_v38 = vld [vmem:[%s7102_s20] ss:$0 sm:$0xff] }
 0xd5d   : > { %v4814_v46 = vadd.f32 %v4813_v43, %v4812_v42  ;;  %v5330_v43 = vld [vmem:[#allocation2] ss:$0 sm:$0xff] }
 0xd63   : > { %v4806_v44 = vpop.f32.mrf.mxu1 }
 0xd64   : > { %v4815_v48 = vsel %vm800_vm1, %v4806_v44, 0.0 }
 0xd65   : > { %v4816_v49 = vadd.f32 %v4815_v48, %v4814_v46  ;;  %v5942_v50 = vpop.f32.mrf.mxu1 }
 0xd67   : > { %v4823_v51 = vadd.f32 %v5302_v47, %v4816_v49 }
 0xd69   : > { %v4824_v52 = vadd.f32 %v4823_v51, %v6664_v3  ;;  %v5308_v3 = vld [vmem:[%s7096_s14 + $0x28] sm:$0xff] }
 0xd6a   : > { %5948 = vmatpush3.msra.mxu0 %v5308_v3 }
 0xd6b   : > { %v4829_v53 = vsel %vm800_vm1, %v4824_v52, 0.0  ;;  %5949 = vmatprep.subr.mxu0 %v6034_v4 }
 0xd6c   : > { %4830 = vadd.xlane.f32.xlu0 %v4829_v53  ;;  %5950 = vmatpush3.msra.mxu0 %v5307_v60 }
 0xdf5   : > { %v4831_v54 = vpop.xlane.xlu0 %4830 }
 0xdf6   : > { %v4832_v55 = vmul.f32 0.03125, %v4831_v54 }
 0xdf8   : > { %v4833_v56 = vsub.f32 %v4824_v52, %v4832_v55 }
 0xdfa   : > { %v4834_v57 = vmul.f32 %v4833_v56, %v4833_v56 }
 0xdfc   : > { %v4835_v58 = vsel %vm800_vm1, %v4834_v57, 0.0 }
 0xdfd   : > { %4836 = vadd.xlane.f32.xlu1 %v4835_v58 }
 0xe86   : > { %v4837_v2 = vpop.xlane.xlu1 %4836 }
 0xe87   : > { %v4838_v5 = vmul.f32 0.03125, %v4837_v2 }
 0xe89   : > { %v4839_v6 = vadd.f32 1e-05, %v4838_v5 }
 0xe8b   : > { %6021 = vrsqrt.f32 %v4839_v6 }
 0xe98   : > { %v6022_v7 = vpop.eup %6021 }
 0xe99   : > { %v4841_v9 = vmul.f32 %v6022_v7, %v4833_v56 }
 0xe9b   : > { %v4848_v11 = vmul.f32 %v5305_v8, %v4841_v9 }
 0xe9d   : > { %v4855_v12 = vadd.f32 %v5306_v10, %v4848_v11 }
 0xe9f   : > { %5952 = vmatmul.mubr.msk.f32.vlgmr.msra.gmra.mxu0 %vm800_vm1, %v4855_v12 }
 0xf5f   : > { %v4938_v16 = vpop.f32.mrf.mxu0 }
 0xf60   : > { %v4939_v17 = vadd.f32 %v5312_v15, %v4938_v16 }
 0xf61   : > { %v5953_v19 = vpop.f32.mrf.mxu0 }
 0xf62   : > { %v4942_v20 = vmax.f32 %v4939_v17, 0.0 }
 0xf64   : > { %5971 = vmatmul.mubr.msk.f32.vlgmr.msra.gmra.mxu1 %vm2778_vm4, %v4942_v20 }
0x1024   : > { %v5029_v22 = vpop.f32.mrf.mxu1 }
0x1025   : > { %v5030_v23 = vadd.f32 %v5323_v21, %v5029_v22 }
0x1026   : > { %v5972_v24 = vpop.f32.mrf.mxu1 }
0x1027   : > { %v5033_v25 = vadd.f32 %v5030_v23, %v4855_v12 }
0x1029   : > { %v5038_v4 = vsel %vm800_vm1, %v5033_v25, 0.0 }
0x102a   : > { %5039 = vadd.xlane.f32.xlu0 %v5038_v4 }
0x10b3   : > { %v5040_v26 = vpop.xlane.xlu0 %5039 }
0x10b4   : > { %v5041_v27 = vmul.f32 0.03125, %v5040_v26 }
0x10b6   : > { %v5042_v28 = vsub.f32 %v5033_v25, %v5041_v27 }
0x10b8   : > { %v5043_v29 = vmul.f32 %v5042_v28, %v5042_v28 }
0x10ba   : > { %v5044_v30 = vsel %vm800_vm1, %v5043_v29, 0.0 }
0x10bb   : > { %5045 = vadd.xlane.f32.xlu1 %v5044_v30 }
0x1144   : > { %v5046_v31 = vpop.xlane.xlu1 %5045 }
0x1145   : > { %v5047_v32 = vmul.f32 0.03125, %v5046_v31 }
0x1147   : > { %v5048_v33 = vadd.f32 1e-05, %v5047_v32 }
0x1149   : > { %6023 = vrsqrt.f32 %v5048_v33 }
0x1156   : > { %v6024_v34 = vpop.eup %6023 }
0x1157   : > { %v5050_v36 = vmul.f32 %v6024_v34, %v5042_v28 }
0x1159   : > { %v5057_v39 = vmul.f32 %v5327_v35, %v5050_v36 }
0x115b   : > { %v5064_v40 = vadd.f32 %v5328_v37, %v5057_v39 }
0x115d   : > { %v5072_v41 = vmul.f32 %v5329_v38, %v5064_v40 }
0x115f   : > { %v5073_v42 = vsel %vm800_vm1, %v5072_v41, 0.0 }
0x1160   : > { %5074 = vadd.xlane.f32.xlu0 %v5073_v42 }
0x11e9   : > { %v5075_v44 = vpop.xlane.xlu0 %5074 }
0x11ea   : > { %v5083_v46 = vadd.f32 %v5330_v43, %v5075_v44 }
0x11ec   : > { %5085 = vst.msk [vmem:[%s680_s25] sm:$0xff] %vm5084_vm5, %v5083_v46 }
0x11ed PF: > { %s34_s29 = sadd.s32 1, %s6031_s29  }
0x11ee   : > { %p31_p4 = scmp.ge.s32.totalorder %s34_s29, 4  }
0x11f0   :  { %33 = sbr.rel (!%p31_p4) target bundleno = 8 (0x8), region = 154 }

</bundles_post_ra>
